<compile_context>
chip_gen: v6e
topology: v6e:2x2x1
jax: 0.10.0
libtpu: 0.0.40
codegen_flags: <defaults>
</compile_context>

<pallas_src>
import functools

import jax
import jax.numpy as jnp
import numpy as np
from jax.experimental import pallas as pl
from jax.experimental.pallas import tpu as pltpu


def _sigmoid(x):
    # exact-to-f32 logistic via tanh: keeps the transcendental on the EUP.
    return 0.5 * jnp.tanh(0.5 * x) + 0.5


# ---------------------------------------------------------------------------
# Fused Pallas kernel
# ---------------------------------------------------------------------------
@functools.lru_cache(maxsize=None)
def _build_fused_kernel(n_conv, H):
    """Builds the fused conv-stack + GRU + head kernel for a given config."""

    def kernel(*refs):
        # ref layout:
        #   x, (w_conv, b_conv) * n_conv,
        #   h0, w_ih, w_hh, b_i_folded, b_hn_padded, w_out, b_out,
        #   y_out, hT_out
        x_ref = refs[0]
        conv_refs = refs[1:1 + 2 * n_conv]
        (h0_ref, wih_ref, whh_ref, bi_ref, bhn_ref,
         wout_ref, bout_ref) = refs[1 + 2 * n_conv:1 + 2 * n_conv + 7]
        y_ref, hT_ref = refs[-2], refs[-1]

        # ------------------------------------------------------------------
        # Conv1d(k=3) + Dropout + ReLU stack in PyTorch (T, C, L) layout,
        # implemented as broadcast multiply-adds on the VPU (tiny channel
        # counts -> MXU would be pure push/pop latency here).
        # TODO(synk): nn.Dropout implemented as eval-mode identity (no RNG drop).
        # ------------------------------------------------------------------
        act = x_ref[...]                                   # (T, Cin, L)
        T = act.shape[0]
        for j in range(n_conv):
            w = conv_refs[2 * j][...]                      # (3, Cin, Cout, 1)
            b = conv_refs[2 * j + 1][...]                  # (1, Cout, 1)
            cin, cout = w.shape[1], w.shape[2]
            lout = act.shape[2] - 2
            acc = jnp.zeros((T, cout, lout), jnp.float32)
            for k in range(3):                             # statically unrolled
                for ci in range(cin):
                    acc = acc + act[:, ci:ci + 1, k:k + lout] * w[k, ci][None]
            act = jnp.maximum(acc + b, 0.0)                # (T, Cout, Lout)

        # conv output (T, C_last, L_last) == GRU input (seq, batch, feature)
        B = act.shape[1]

        # ------------------------------------------------------------------
        # GRU: hoisted input-gate matmul + single recurrent matmul per step.
        # ------------------------------------------------------------------
        wih = wih_ref[...]                                 # (I, 3H)  cols [r|z|n]
        whh = whh_ref[...]                                 # (H, 3H)  cols [r|z|n]
        b_i = bi_ref[...]                                  # (1, 3H) = [bir+bhr|biz+bhz|bin]
        b_hn = bhn_ref[...]                                # (1, 3H) = [0|0|bhn]

        # All input gates for all timesteps in one batched MXU matmul
        # (independent of the hidden state -> completely off the serial chain).
        gi_all = jax.lax.dot_general(
            act, wih, dimension_numbers=(((2,), (0,)), ((), ())),
            preferred_element_type=jnp.float32) + b_i[None]   # (T, B, 3H)

        h = h0_ref[...]                                    # (B, H)
        hs = []
        for t in range(T):                                 # fully unrolled
            gh = jnp.dot(h, whh, preferred_element_type=jnp.float32) + b_hn
            g = gi_all[t]                                  # (B, 3H)
            r = _sigmoid(g[:, :H] + gh[:, :H])
            z = _sigmoid(g[:, H:2 * H] + gh[:, H:2 * H])
            n = jnp.tanh(g[:, 2 * H:] + r * gh[:, 2 * H:])
            h = (1.0 - z) * n + z * h
            hs.append(h)

        hT_ref[0] = h                                      # (1, B, H)

        # ------------------------------------------------------------------
        # Linear(H, 1) + ReLU head as VPU multiply + lane reduce; lane-dense
        # (T, B) output (PyTorch's .squeeze()).
        # ------------------------------------------------------------------
        hs_all = jnp.stack(hs, axis=0)                     # (T, B, H)
        wout = wout_ref[...]                               # (1, H)
        y = jnp.sum(hs_all * wout[None], axis=-1)          # (T, B)
        y_ref[...] = jnp.maximum(y + bout_ref[...], 0.0)   # bout: (1, 1)

    return kernel


# ---------------------------------------------------------------------------
# Wrappers: one-time parameter packing + forward call
# ---------------------------------------------------------------------------
def _vmem():
    return pl.BlockSpec(memory_space=pltpu.MemorySpace.VMEM)


def pack_params(params):
    """One-time repack of PyTorch-layout parameters into kernel layouts."""
    convs = params["convs"]
    n_conv = len(convs)
    conv_flat = []
    for (w, b) in convs:                                   # w: (Cout, Cin, 3)
        cout = w.shape[0]
        # (Cout, Cin, 3) -> (3, Cin, Cout, 1): w_p[k, ci, co, 0] = w[co, ci, k]
        conv_flat.append(jnp.transpose(w, (2, 1, 0))[..., None].astype(jnp.float32))
        conv_flat.append(b.reshape(1, cout, 1).astype(jnp.float32))

    H = int(params["rnn_hidden"])
    w_ih = params["w_ih"].astype(jnp.float32)              # (3H, I)
    w_hh = params["w_hh"].astype(jnp.float32)              # (3H, H)
    b_ih = params["b_ih"].astype(jnp.float32)              # (3H,)
    b_hh = params["b_hh"].astype(jnp.float32)              # (3H,)
    wih = jnp.transpose(w_ih)                              # (I, 3H)
    whh = jnp.transpose(w_hh)                              # (H, 3H)
    b_i = jnp.concatenate([b_ih[:2 * H] + b_hh[:2 * H],
                           b_ih[2 * H:]]).reshape(1, 3 * H)
    b_hn = jnp.concatenate([jnp.zeros((2 * H,), jnp.float32),
                            b_hh[2 * H:]]).reshape(1, 3 * H)
    wout = params["w_out"].reshape(1, H).astype(jnp.float32)
    bout = params["b_out"].reshape(1, 1).astype(jnp.float32)

    return {
        "n_conv": n_conv,
        "B": int(convs[-1][0].shape[0]),
        "H": H,
        "conv_flat": tuple(conv_flat),
        "gru_flat": (wih, whh, b_i, b_hn, wout, bout),
    }


def core_algo_forward(packed, x, hidden=None):
    """Fused forward; returns (y.squeeze(), h_n) like the PyTorch module."""
    x = jnp.asarray(x, jnp.float32)                        # (T, 1, num_inputs+1)
    T = x.shape[0]
    n_conv, B, H = packed["n_conv"], packed["B"], packed["H"]
    h0 = (jnp.zeros((B, H), jnp.float32) if hidden is None
          else jnp.asarray(hidden, jnp.float32).reshape(B, H))
    args = (x,) + packed["conv_flat"] + (h0,) + packed["gru_flat"]
    kernel = _build_fused_kernel(n_conv, H)
    y, hT = pl.pallas_call(
        kernel,
        out_shape=(jax.ShapeDtypeStruct((T, B), jnp.float32),
                   jax.ShapeDtypeStruct((1, B, H), jnp.float32)),
        in_specs=[_vmem() for _ in args],
        out_specs=(_vmem(), _vmem()),
    )(*args)
    return y, hT


# ---------------------------------------------------------------------------
# Deterministic parameter init (PyTorch-style uniform fan-in bounds)
# ---------------------------------------------------------------------------
def init_params(key, num_inputs, cnn_dims, rnn_hidden):
    dims = [1] + list(cnn_dims)
    n_conv = len(cnn_dims)
    gru_in = num_inputs + 1 - 2 * n_conv
    keys = iter(jax.random.split(key, 2 * n_conv + 6))

    def unif(k, shape, fan_in):
        bound = 1.0 / np.sqrt(fan_in)
        return jax.random.uniform(k, shape, jnp.float32, -bound, bound)

    convs = []
    for cin, cout in zip(dims[:-1], dims[1:]):
        w = unif(next(keys), (cout, cin, 3), cin * 3)
        b = unif(next(keys), (cout,), cin * 3)
        convs.append((w, b))

    H = rnn_hidden
    return {
        "convs": convs,
        "rnn_hidden": H,
        "w_ih": unif(next(keys), (3 * H, gru_in), H),
        "w_hh": unif(next(keys), (3 * H, H), H),
        "b_ih": unif(next(keys), (3 * H,), H),
        "b_hh": unif(next(keys), (3 * H,), H),
        "w_out": unif(next(keys), (1, H), H),
        "b_out": unif(next(keys), (1,), H),
    }


# ---------------------------------------------------------------------------
# Pure-JAX reference (mirrors PyTorch semantics) for correctness checking
# ---------------------------------------------------------------------------
def reference_forward(params, x, hidden=None):
    h = x.astype(jnp.float32)                              # (T, Cin, L)
    for (w, b) in params["convs"]:
        T, _, L = h.shape
        lout = L - 2
        out = jnp.zeros((T, w.shape[0], lout), jnp.float32)
        for k in range(3):
            out = out + jnp.einsum("tcl,oc->tol", h[:, :, k:k + lout], w[:, :, k])
        h = jnp.maximum(out + b[None, :, None], 0.0)
    seq = h                                                # (T, B, I)
    B = seq.shape[1]
    H = params["rnn_hidden"]
    h0 = jnp.zeros((B, H), jnp.float32) if hidden is None else jnp.asarray(
        hidden, jnp.float32).reshape(B, H)
    wih, whh = params["w_ih"], params["w_hh"]
    bih, bhh = params["b_ih"], params["b_hh"]

    def step(hprev, xt):
        gi = xt @ wih.T + bih
        gh = hprev @ whh.T + bhh
        r = jax.nn.sigmoid(gi[:, :H] + gh[:, :H])
        z = jax.nn.sigmoid(gi[:, H:2 * H] + gh[:, H:2 * H])
        n = jnp.tanh(gi[:, 2 * H:] + r * gh[:, 2 * H:])
        hn = (1.0 - z) * n + z * hprev
        return hn, hn

    hT, hs = jax.lax.scan(step, h0, seq)
    y = jnp.maximum(hs @ params["w_out"].T + params["b_out"], 0.0)
    return jnp.squeeze(y), hT[None]


# ---------------------------------------------------------------------------
if __name__ == "__main__":
    num_inputs = 15        # conv input length = num_inputs + 1 = 16
    cnn_dims = [4, 8]      # 2 conv layers -> GRU batch = 8, GRU input = 16 - 4 = 12
    rnn_hidden = 32
    T = 8                  # sequence length (Conv1d "N" dim)

    key = jax.random.PRNGKey(0)
    pkey, xkey, hkey = jax.random.split(key, 3)
    params = init_params(pkey, num_inputs, cnn_dims, rnn_hidden)
    packed = pack_params(params)
    x = jax.random.normal(xkey, (T, 1, num_inputs + 1), jnp.float32)

    # hidden = None path
    y, h_n = core_algo_forward(packed, x, hidden=None)
    y = jax.block_until_ready(y)
    h_n = jax.block_until_ready(h_n)
    y_ref, h_ref = reference_forward(params, x, hidden=None)
    np.testing.assert_allclose(np.asarray(y), np.asarray(y_ref), rtol=5e-3, atol=5e-3)
    np.testing.assert_allclose(np.asarray(h_n), np.asarray(h_ref), rtol=5e-3, atol=5e-3)

    # explicit hidden path
    hidden = 0.5 * jax.random.normal(hkey, (1, cnn_dims[-1], rnn_hidden), jnp.float32)
    y2, h_n2 = core_algo_forward(packed, x, hidden=hidden)
    y2 = jax.block_until_ready(y2)
    h_n2 = jax.block_until_ready(h_n2)
    y2_ref, h2_ref = reference_forward(params, x, hidden=hidden)
    np.testing.assert_allclose(np.asarray(y2), np.asarray(y2_ref), rtol=5e-3, atol=5e-3)
    np.testing.assert_allclose(np.asarray(h_n2), np.asarray(h2_ref), rtol=5e-3, atol=5e-3)

    assert y.shape == (T, cnn_dims[-1])
    assert h_n.shape == (1, cnn_dims[-1], rnn_hidden)
    print("KERNEL_OK")
</pallas_src>

<mosaic_0001>
module attributes {stable_mosaic.version = 11 : i64} {
  func.func @kernel(%arg0: memref<8x1x16xf32, #tpu.memory_space<vmem>>, %arg1: memref<3x1x4x1xf32, #tpu.memory_space<vmem>>, %arg2: memref<1x4x1xf32, #tpu.memory_space<vmem>>, %arg3: memref<3x4x8x1xf32, #tpu.memory_space<vmem>>, %arg4: memref<1x8x1xf32, #tpu.memory_space<vmem>>, %arg5: memref<8x32xf32, #tpu.memory_space<vmem>>, %arg6: memref<12x96xf32, #tpu.memory_space<vmem>>, %arg7: memref<32x96xf32, #tpu.memory_space<vmem>>, %arg8: memref<1x96xf32, #tpu.memory_space<vmem>>, %arg9: memref<1x96xf32, #tpu.memory_space<vmem>>, %arg10: memref<1x32xf32, #tpu.memory_space<vmem>>, %arg11: memref<1x1xf32, #tpu.memory_space<vmem>>, %arg12: memref<8x8xf32, #tpu.memory_space<vmem>>, %arg13: memref<1x8x32xf32, #tpu.memory_space<vmem>>) attributes {dimension_semantics = [], scalar_prefetch = 0 : i64, scratch_operands = 0 : i64, tpu.core_type = #tpu.core_type<tc>} {
    %c0 = arith.constant 0 : index
    %c0_0 = arith.constant 0 : index
    %c0_1 = arith.constant 0 : index
    %0 = vector.load %arg0[%c0, %c0_0, %c0_1] : memref<8x1x16xf32, #tpu.memory_space<vmem>>, vector<8x1x16xf32>
    %c0_2 = arith.constant 0 : index
    %c0_3 = arith.constant 0 : index
    %c0_4 = arith.constant 0 : index
    %c0_5 = arith.constant 0 : index
    %1 = vector.load %arg1[%c0_2, %c0_3, %c0_4, %c0_5] : memref<3x1x4x1xf32, #tpu.memory_space<vmem>>, vector<3x1x4x1xf32>
    %c0_6 = arith.constant 0 : index
    %c0_7 = arith.constant 0 : index
    %c0_8 = arith.constant 0 : index
    %2 = vector.load %arg2[%c0_6, %c0_7, %c0_8] : memref<1x4x1xf32, #tpu.memory_space<vmem>>, vector<1x4x1xf32>
    %cst = arith.constant 0.000000e+00 : f32
    %3 = vector.broadcast %cst : f32 to vector<8x4x14xf32>
    %4 = vector.extract_strided_slice %0 {offsets = [0, 0, 0], sizes = [8, 1, 14], strides = [1, 1, 1]} : vector<8x1x16xf32> to vector<8x1x14xf32>
    %5 = vector.extract_strided_slice %1 {offsets = [0, 0, 0, 0], sizes = [1, 1, 4, 1], strides = [1, 1, 1, 1]} : vector<3x1x4x1xf32> to vector<1x1x4x1xf32>
    %6 = vector.shape_cast %5 : vector<1x1x4x1xf32> to vector<4x1xf32>
    %7 = vector.shape_cast %6 : vector<4x1xf32> to vector<1x4x1xf32>
    %8 = vector.broadcast %4 : vector<8x1x14xf32> to vector<8x4x14xf32>
    %9 = vector.broadcast %7 : vector<1x4x1xf32> to vector<8x4x14xf32>
    %10 = arith.mulf %8, %9 : vector<8x4x14xf32>
    %11 = arith.addf %3, %10 : vector<8x4x14xf32>
    %12 = vector.extract_strided_slice %0 {offsets = [0, 0, 1], sizes = [8, 1, 14], strides = [1, 1, 1]} : vector<8x1x16xf32> to vector<8x1x14xf32>
    %13 = vector.extract_strided_slice %1 {offsets = [1, 0, 0, 0], sizes = [1, 1, 4, 1], strides = [1, 1, 1, 1]} : vector<3x1x4x1xf32> to vector<1x1x4x1xf32>
    %14 = vector.shape_cast %13 : vector<1x1x4x1xf32> to vector<4x1xf32>
    %15 = vector.shape_cast %14 : vector<4x1xf32> to vector<1x4x1xf32>
    %16 = vector.broadcast %12 : vector<8x1x14xf32> to vector<8x4x14xf32>
    %17 = vector.broadcast %15 : vector<1x4x1xf32> to vector<8x4x14xf32>
    %18 = arith.mulf %16, %17 : vector<8x4x14xf32>
    %19 = arith.addf %11, %18 : vector<8x4x14xf32>
    %20 = vector.extract_strided_slice %0 {offsets = [0, 0, 2], sizes = [8, 1, 14], strides = [1, 1, 1]} : vector<8x1x16xf32> to vector<8x1x14xf32>
    %21 = vector.extract_strided_slice %1 {offsets = [2, 0, 0, 0], sizes = [1, 1, 4, 1], strides = [1, 1, 1, 1]} : vector<3x1x4x1xf32> to vector<1x1x4x1xf32>
    %22 = vector.shape_cast %21 : vector<1x1x4x1xf32> to vector<4x1xf32>
    %23 = vector.shape_cast %22 : vector<4x1xf32> to vector<1x4x1xf32>
    %24 = vector.broadcast %20 : vector<8x1x14xf32> to vector<8x4x14xf32>
    %25 = vector.broadcast %23 : vector<1x4x1xf32> to vector<8x4x14xf32>
    %26 = arith.mulf %24, %25 : vector<8x4x14xf32>
    %27 = arith.addf %19, %26 : vector<8x4x14xf32>
    %28 = vector.broadcast %2 : vector<1x4x1xf32> to vector<8x4x14xf32>
    %29 = arith.addf %27, %28 : vector<8x4x14xf32>
    %cst_9 = arith.constant 0.000000e+00 : f32
    %30 = vector.broadcast %cst_9 : f32 to vector<8x4x14xf32>
    %31 = arith.maximumf %29, %30 : vector<8x4x14xf32>
    %c0_10 = arith.constant 0 : index
    %c0_11 = arith.constant 0 : index
    %c0_12 = arith.constant 0 : index
    %c0_13 = arith.constant 0 : index
    %32 = vector.load %arg3[%c0_10, %c0_11, %c0_12, %c0_13] : memref<3x4x8x1xf32, #tpu.memory_space<vmem>>, vector<3x4x8x1xf32>
    %c0_14 = arith.constant 0 : index
    %c0_15 = arith.constant 0 : index
    %c0_16 = arith.constant 0 : index
    %33 = vector.load %arg4[%c0_14, %c0_15, %c0_16] : memref<1x8x1xf32, #tpu.memory_space<vmem>>, vector<1x8x1xf32>
    %cst_17 = arith.constant 0.000000e+00 : f32
    %34 = vector.broadcast %cst_17 : f32 to vector<8x8x12xf32>
    %35 = vector.extract_strided_slice %31 {offsets = [0, 0, 0], sizes = [8, 1, 12], strides = [1, 1, 1]} : vector<8x4x14xf32> to vector<8x1x12xf32>
    %36 = vector.extract_strided_slice %32 {offsets = [0, 0, 0, 0], sizes = [1, 1, 8, 1], strides = [1, 1, 1, 1]} : vector<3x4x8x1xf32> to vector<1x1x8x1xf32>
    %37 = vector.shape_cast %36 : vector<1x1x8x1xf32> to vector<8x1xf32>
    %38 = vector.shape_cast %37 : vector<8x1xf32> to vector<1x8x1xf32>
    %39 = vector.broadcast %35 : vector<8x1x12xf32> to vector<8x8x12xf32>
    %40 = vector.broadcast %38 : vector<1x8x1xf32> to vector<8x8x12xf32>
    %41 = arith.mulf %39, %40 : vector<8x8x12xf32>
    %42 = arith.addf %34, %41 : vector<8x8x12xf32>
    %43 = vector.extract_strided_slice %31 {offsets = [0, 1, 0], sizes = [8, 1, 12], strides = [1, 1, 1]} : vector<8x4x14xf32> to vector<8x1x12xf32>
    %44 = vector.extract_strided_slice %32 {offsets = [0, 1, 0, 0], sizes = [1, 1, 8, 1], strides = [1, 1, 1, 1]} : vector<3x4x8x1xf32> to vector<1x1x8x1xf32>
    %45 = vector.shape_cast %44 : vector<1x1x8x1xf32> to vector<8x1xf32>
    %46 = vector.shape_cast %45 : vector<8x1xf32> to vector<1x8x1xf32>
    %47 = vector.broadcast %43 : vector<8x1x12xf32> to vector<8x8x12xf32>
    %48 = vector.broadcast %46 : vector<1x8x1xf32> to vector<8x8x12xf32>
    %49 = arith.mulf %47, %48 : vector<8x8x12xf32>
    %50 = arith.addf %42, %49 : vector<8x8x12xf32>
    %51 = vector.extract_strided_slice %31 {offsets = [0, 2, 0], sizes = [8, 1, 12], strides = [1, 1, 1]} : vector<8x4x14xf32> to vector<8x1x12xf32>
    %52 = vector.extract_strided_slice %32 {offsets = [0, 2, 0, 0], sizes = [1, 1, 8, 1], strides = [1, 1, 1, 1]} : vector<3x4x8x1xf32> to vector<1x1x8x1xf32>
    %53 = vector.shape_cast %52 : vector<1x1x8x1xf32> to vector<8x1xf32>
    %54 = vector.shape_cast %53 : vector<8x1xf32> to vector<1x8x1xf32>
    %55 = vector.broadcast %51 : vector<8x1x12xf32> to vector<8x8x12xf32>
    %56 = vector.broadcast %54 : vector<1x8x1xf32> to vector<8x8x12xf32>
    %57 = arith.mulf %55, %56 : vector<8x8x12xf32>
    %58 = arith.addf %50, %57 : vector<8x8x12xf32>
    %59 = vector.extract_strided_slice %31 {offsets = [0, 3, 0], sizes = [8, 1, 12], strides = [1, 1, 1]} : vector<8x4x14xf32> to vector<8x1x12xf32>
    %60 = vector.extract_strided_slice %32 {offsets = [0, 3, 0, 0], sizes = [1, 1, 8, 1], strides = [1, 1, 1, 1]} : vector<3x4x8x1xf32> to vector<1x1x8x1xf32>
    %61 = vector.shape_cast %60 : vector<1x1x8x1xf32> to vector<8x1xf32>
    %62 = vector.shape_cast %61 : vector<8x1xf32> to vector<1x8x1xf32>
    %63 = vector.broadcast %59 : vector<8x1x12xf32> to vector<8x8x12xf32>
    %64 = vector.broadcast %62 : vector<1x8x1xf32> to vector<8x8x12xf32>
    %65 = arith.mulf %63, %64 : vector<8x8x12xf32>
    %66 = arith.addf %58, %65 : vector<8x8x12xf32>
    %67 = vector.extract_strided_slice %31 {offsets = [0, 0, 1], sizes = [8, 1, 12], strides = [1, 1, 1]} : vector<8x4x14xf32> to vector<8x1x12xf32>
    %68 = vector.extract_strided_slice %32 {offsets = [1, 0, 0, 0], sizes = [1, 1, 8, 1], strides = [1, 1, 1, 1]} : vector<3x4x8x1xf32> to vector<1x1x8x1xf32>
    %69 = vector.shape_cast %68 : vector<1x1x8x1xf32> to vector<8x1xf32>
    %70 = vector.shape_cast %69 : vector<8x1xf32> to vector<1x8x1xf32>
    %71 = vector.broadcast %67 : vector<8x1x12xf32> to vector<8x8x12xf32>
    %72 = vector.broadcast %70 : vector<1x8x1xf32> to vector<8x8x12xf32>
    %73 = arith.mulf %71, %72 : vector<8x8x12xf32>
    %74 = arith.addf %66, %73 : vector<8x8x12xf32>
    %75 = vector.extract_strided_slice %31 {offsets = [0, 1, 1], sizes = [8, 1, 12], strides = [1, 1, 1]} : vector<8x4x14xf32> to vector<8x1x12xf32>
    %76 = vector.extract_strided_slice %32 {offsets = [1, 1, 0, 0], sizes = [1, 1, 8, 1], strides = [1, 1, 1, 1]} : vector<3x4x8x1xf32> to vector<1x1x8x1xf32>
    %77 = vector.shape_cast %76 : vector<1x1x8x1xf32> to vector<8x1xf32>
    %78 = vector.shape_cast %77 : vector<8x1xf32> to vector<1x8x1xf32>
    %79 = vector.broadcast %75 : vector<8x1x12xf32> to vector<8x8x12xf32>
    %80 = vector.broadcast %78 : vector<1x8x1xf32> to vector<8x8x12xf32>
    %81 = arith.mulf %79, %80 : vector<8x8x12xf32>
    %82 = arith.addf %74, %81 : vector<8x8x12xf32>
    %83 = vector.extract_strided_slice %31 {offsets = [0, 2, 1], sizes = [8, 1, 12], strides = [1, 1, 1]} : vector<8x4x14xf32> to vector<8x1x12xf32>
    %84 = vector.extract_strided_slice %32 {offsets = [1, 2, 0, 0], sizes = [1, 1, 8, 1], strides = [1, 1, 1, 1]} : vector<3x4x8x1xf32> to vector<1x1x8x1xf32>
    %85 = vector.shape_cast %84 : vector<1x1x8x1xf32> to vector<8x1xf32>
    %86 = vector.shape_cast %85 : vector<8x1xf32> to vector<1x8x1xf32>
    %87 = vector.broadcast %83 : vector<8x1x12xf32> to vector<8x8x12xf32>
    %88 = vector.broadcast %86 : vector<1x8x1xf32> to vector<8x8x12xf32>
    %89 = arith.mulf %87, %88 : vector<8x8x12xf32>
    %90 = arith.addf %82, %89 : vector<8x8x12xf32>
    %91 = vector.extract_strided_slice %31 {offsets = [0, 3, 1], sizes = [8, 1, 12], strides = [1, 1, 1]} : vector<8x4x14xf32> to vector<8x1x12xf32>
    %92 = vector.extract_strided_slice %32 {offsets = [1, 3, 0, 0], sizes = [1, 1, 8, 1], strides = [1, 1, 1, 1]} : vector<3x4x8x1xf32> to vector<1x1x8x1xf32>
    %93 = vector.shape_cast %92 : vector<1x1x8x1xf32> to vector<8x1xf32>
    %94 = vector.shape_cast %93 : vector<8x1xf32> to vector<1x8x1xf32>
    %95 = vector.broadcast %91 : vector<8x1x12xf32> to vector<8x8x12xf32>
    %96 = vector.broadcast %94 : vector<1x8x1xf32> to vector<8x8x12xf32>
    %97 = arith.mulf %95, %96 : vector<8x8x12xf32>
    %98 = arith.addf %90, %97 : vector<8x8x12xf32>
    %99 = vector.extract_strided_slice %31 {offsets = [0, 0, 2], sizes = [8, 1, 12], strides = [1, 1, 1]} : vector<8x4x14xf32> to vector<8x1x12xf32>
    %100 = vector.extract_strided_slice %32 {offsets = [2, 0, 0, 0], sizes = [1, 1, 8, 1], strides = [1, 1, 1, 1]} : vector<3x4x8x1xf32> to vector<1x1x8x1xf32>
    %101 = vector.shape_cast %100 : vector<1x1x8x1xf32> to vector<8x1xf32>
    %102 = vector.shape_cast %101 : vector<8x1xf32> to vector<1x8x1xf32>
    %103 = vector.broadcast %99 : vector<8x1x12xf32> to vector<8x8x12xf32>
    %104 = vector.broadcast %102 : vector<1x8x1xf32> to vector<8x8x12xf32>
    %105 = arith.mulf %103, %104 : vector<8x8x12xf32>
    %106 = arith.addf %98, %105 : vector<8x8x12xf32>
    %107 = vector.extract_strided_slice %31 {offsets = [0, 1, 2], sizes = [8, 1, 12], strides = [1, 1, 1]} : vector<8x4x14xf32> to vector<8x1x12xf32>
    %108 = vector.extract_strided_slice %32 {offsets = [2, 1, 0, 0], sizes = [1, 1, 8, 1], strides = [1, 1, 1, 1]} : vector<3x4x8x1xf32> to vector<1x1x8x1xf32>
    %109 = vector.shape_cast %108 : vector<1x1x8x1xf32> to vector<8x1xf32>
    %110 = vector.shape_cast %109 : vector<8x1xf32> to vector<1x8x1xf32>
    %111 = vector.broadcast %107 : vector<8x1x12xf32> to vector<8x8x12xf32>
    %112 = vector.broadcast %110 : vector<1x8x1xf32> to vector<8x8x12xf32>
    %113 = arith.mulf %111, %112 : vector<8x8x12xf32>
    %114 = arith.addf %106, %113 : vector<8x8x12xf32>
    %115 = vector.extract_strided_slice %31 {offsets = [0, 2, 2], sizes = [8, 1, 12], strides = [1, 1, 1]} : vector<8x4x14xf32> to vector<8x1x12xf32>
    %116 = vector.extract_strided_slice %32 {offsets = [2, 2, 0, 0], sizes = [1, 1, 8, 1], strides = [1, 1, 1, 1]} : vector<3x4x8x1xf32> to vector<1x1x8x1xf32>
    %117 = vector.shape_cast %116 : vector<1x1x8x1xf32> to vector<8x1xf32>
    %118 = vector.shape_cast %117 : vector<8x1xf32> to vector<1x8x1xf32>
    %119 = vector.broadcast %115 : vector<8x1x12xf32> to vector<8x8x12xf32>
    %120 = vector.broadcast %118 : vector<1x8x1xf32> to vector<8x8x12xf32>
    %121 = arith.mulf %119, %120 : vector<8x8x12xf32>
    %122 = arith.addf %114, %121 : vector<8x8x12xf32>
    %123 = vector.extract_strided_slice %31 {offsets = [0, 3, 2], sizes = [8, 1, 12], strides = [1, 1, 1]} : vector<8x4x14xf32> to vector<8x1x12xf32>
    %124 = vector.extract_strided_slice %32 {offsets = [2, 3, 0, 0], sizes = [1, 1, 8, 1], strides = [1, 1, 1, 1]} : vector<3x4x8x1xf32> to vector<1x1x8x1xf32>
    %125 = vector.shape_cast %124 : vector<1x1x8x1xf32> to vector<8x1xf32>
    %126 = vector.shape_cast %125 : vector<8x1xf32> to vector<1x8x1xf32>
    %127 = vector.broadcast %123 : vector<8x1x12xf32> to vector<8x8x12xf32>
    %128 = vector.broadcast %126 : vector<1x8x1xf32> to vector<8x8x12xf32>
    %129 = arith.mulf %127, %128 : vector<8x8x12xf32>
    %130 = arith.addf %122, %129 : vector<8x8x12xf32>
    %131 = vector.broadcast %33 : vector<1x8x1xf32> to vector<8x8x12xf32>
    %132 = arith.addf %130, %131 : vector<8x8x12xf32>
    %cst_18 = arith.constant 0.000000e+00 : f32
    %133 = vector.broadcast %cst_18 : f32 to vector<8x8x12xf32>
    %134 = arith.maximumf %132, %133 : vector<8x8x12xf32>
    %c0_19 = arith.constant 0 : index
    %c0_20 = arith.constant 0 : index
    %135 = vector.load %arg6[%c0_19, %c0_20] : memref<12x96xf32, #tpu.memory_space<vmem>>, vector<12x96xf32>
    %c0_21 = arith.constant 0 : index
    %c0_22 = arith.constant 0 : index
    %136 = vector.load %arg7[%c0_21, %c0_22] : memref<32x96xf32, #tpu.memory_space<vmem>>, vector<32x96xf32>
    %c0_23 = arith.constant 0 : index
    %c0_24 = arith.constant 0 : index
    %137 = vector.load %arg8[%c0_23, %c0_24] : memref<1x96xf32, #tpu.memory_space<vmem>>, vector<1x96xf32>
    %c0_25 = arith.constant 0 : index
    %c0_26 = arith.constant 0 : index
    %138 = vector.load %arg9[%c0_25, %c0_26] : memref<1x96xf32, #tpu.memory_space<vmem>>, vector<1x96xf32>
    %cst_27 = arith.constant dense<0.000000e+00> : vector<8x8x96xf32>
    %139 = tpu.matmul %134, %135, %cst_27 {dimension_numbers = #tpu.dot_dimension_numbers<[2], [0], [0, 1], [1], [0, 0, 0, 1, 1, 1], [], []>} : vector<8x8x12xf32>, vector<12x96xf32>, vector<8x8x96xf32> -> vector<8x8x96xf32>
    %140 = vector.shape_cast %137 : vector<1x96xf32> to vector<1x1x96xf32>
    %141 = vector.broadcast %140 : vector<1x1x96xf32> to vector<8x8x96xf32>
    %142 = arith.addf %139, %141 : vector<8x8x96xf32>
    %c0_28 = arith.constant 0 : index
    %c0_29 = arith.constant 0 : index
    %143 = vector.load %arg5[%c0_28, %c0_29] : memref<8x32xf32, #tpu.memory_space<vmem>>, vector<8x32xf32>
    %cst_30 = arith.constant dense<0.000000e+00> : vector<8x96xf32>
    %144 = tpu.matmul %143, %136, %cst_30 {dimension_numbers = #tpu.dot_dimension_numbers<[1], [0], [0], [1], [0, 0, 1, 1], [], []>} : vector<8x32xf32>, vector<32x96xf32>, vector<8x96xf32> -> vector<8x96xf32>
    %145 = vector.broadcast %138 : vector<1x96xf32> to vector<8x96xf32>
    %146 = arith.addf %144, %145 : vector<8x96xf32>
    %147 = vector.extract_strided_slice %142 {offsets = [0, 0, 0], sizes = [1, 8, 96], strides = [1, 1, 1]} : vector<8x8x96xf32> to vector<1x8x96xf32>
    %148 = vector.shape_cast %147 : vector<1x8x96xf32> to vector<8x96xf32>
    %149 = vector.extract_strided_slice %148 {offsets = [0, 0], sizes = [8, 32], strides = [1, 1]} : vector<8x96xf32> to vector<8x32xf32>
    %150 = vector.extract_strided_slice %146 {offsets = [0, 0], sizes = [8, 32], strides = [1, 1]} : vector<8x96xf32> to vector<8x32xf32>
    %151 = arith.addf %149, %150 : vector<8x32xf32>
    %cst_31 = arith.constant 5.000000e-01 : f32
    %152 = vector.broadcast %cst_31 : f32 to vector<8x32xf32>
    %153 = arith.mulf %152, %151 : vector<8x32xf32>
    %154 = math.tanh %153 : vector<8x32xf32>
    %cst_32 = arith.constant 5.000000e-01 : f32
    %155 = vector.broadcast %cst_32 : f32 to vector<8x32xf32>
    %156 = arith.mulf %155, %154 : vector<8x32xf32>
    %cst_33 = arith.constant 5.000000e-01 : f32
    %157 = vector.broadcast %cst_33 : f32 to vector<8x32xf32>
    %158 = arith.addf %156, %157 : vector<8x32xf32>
    %159 = vector.extract_strided_slice %148 {offsets = [0, 32], sizes = [8, 32], strides = [1, 1]} : vector<8x96xf32> to vector<8x32xf32>
    %160 = vector.extract_strided_slice %146 {offsets = [0, 32], sizes = [8, 32], strides = [1, 1]} : vector<8x96xf32> to vector<8x32xf32>
    %161 = arith.addf %159, %160 : vector<8x32xf32>
    %cst_34 = arith.constant 5.000000e-01 : f32
    %162 = vector.broadcast %cst_34 : f32 to vector<8x32xf32>
    %163 = arith.mulf %162, %161 : vector<8x32xf32>
    %164 = math.tanh %163 : vector<8x32xf32>
    %cst_35 = arith.constant 5.000000e-01 : f32
    %165 = vector.broadcast %cst_35 : f32 to vector<8x32xf32>
    %166 = arith.mulf %165, %164 : vector<8x32xf32>
    %cst_36 = arith.constant 5.000000e-01 : f32
    %167 = vector.broadcast %cst_36 : f32 to vector<8x32xf32>
    %168 = arith.addf %166, %167 : vector<8x32xf32>
    %169 = vector.extract_strided_slice %148 {offsets = [0, 64], sizes = [8, 32], strides = [1, 1]} : vector<8x96xf32> to vector<8x32xf32>
    %170 = vector.extract_strided_slice %146 {offsets = [0, 64], sizes = [8, 32], strides = [1, 1]} : vector<8x96xf32> to vector<8x32xf32>
    %171 = arith.mulf %158, %170 : vector<8x32xf32>
    %172 = arith.addf %169, %171 : vector<8x32xf32>
    %173 = math.tanh %172 : vector<8x32xf32>
    %cst_37 = arith.constant 1.000000e+00 : f32
    %174 = vector.broadcast %cst_37 : f32 to vector<8x32xf32>
    %175 = arith.subf %174, %168 : vector<8x32xf32>
    %176 = arith.mulf %175, %173 : vector<8x32xf32>
    %177 = arith.mulf %168, %143 : vector<8x32xf32>
    %178 = arith.addf %176, %177 : vector<8x32xf32>
    %cst_38 = arith.constant dense<0.000000e+00> : vector<8x96xf32>
    %179 = tpu.matmul %178, %136, %cst_38 {dimension_numbers = #tpu.dot_dimension_numbers<[1], [0], [0], [1], [0, 0, 1, 1], [], []>} : vector<8x32xf32>, vector<32x96xf32>, vector<8x96xf32> -> vector<8x96xf32>
    %180 = vector.broadcast %138 : vector<1x96xf32> to vector<8x96xf32>
    %181 = arith.addf %179, %180 : vector<8x96xf32>
    %182 = vector.extract_strided_slice %142 {offsets = [1, 0, 0], sizes = [1, 8, 96], strides = [1, 1, 1]} : vector<8x8x96xf32> to vector<1x8x96xf32>
    %183 = vector.shape_cast %182 : vector<1x8x96xf32> to vector<8x96xf32>
    %184 = vector.extract_strided_slice %183 {offsets = [0, 0], sizes = [8, 32], strides = [1, 1]} : vector<8x96xf32> to vector<8x32xf32>
    %185 = vector.extract_strided_slice %181 {offsets = [0, 0], sizes = [8, 32], strides = [1, 1]} : vector<8x96xf32> to vector<8x32xf32>
    %186 = arith.addf %184, %185 : vector<8x32xf32>
    %cst_39 = arith.constant 5.000000e-01 : f32
    %187 = vector.broadcast %cst_39 : f32 to vector<8x32xf32>
    %188 = arith.mulf %187, %186 : vector<8x32xf32>
    %189 = math.tanh %188 : vector<8x32xf32>
    %cst_40 = arith.constant 5.000000e-01 : f32
    %190 = vector.broadcast %cst_40 : f32 to vector<8x32xf32>
    %191 = arith.mulf %190, %189 : vector<8x32xf32>
    %cst_41 = arith.constant 5.000000e-01 : f32
    %192 = vector.broadcast %cst_41 : f32 to vector<8x32xf32>
    %193 = arith.addf %191, %192 : vector<8x32xf32>
    %194 = vector.extract_strided_slice %183 {offsets = [0, 32], sizes = [8, 32], strides = [1, 1]} : vector<8x96xf32> to vector<8x32xf32>
    %195 = vector.extract_strided_slice %181 {offsets = [0, 32], sizes = [8, 32], strides = [1, 1]} : vector<8x96xf32> to vector<8x32xf32>
    %196 = arith.addf %194, %195 : vector<8x32xf32>
    %cst_42 = arith.constant 5.000000e-01 : f32
    %197 = vector.broadcast %cst_42 : f32 to vector<8x32xf32>
    %198 = arith.mulf %197, %196 : vector<8x32xf32>
    %199 = math.tanh %198 : vector<8x32xf32>
    %cst_43 = arith.constant 5.000000e-01 : f32
    %200 = vector.broadcast %cst_43 : f32 to vector<8x32xf32>
    %201 = arith.mulf %200, %199 : vector<8x32xf32>
    %cst_44 = arith.constant 5.000000e-01 : f32
    %202 = vector.broadcast %cst_44 : f32 to vector<8x32xf32>
    %203 = arith.addf %201, %202 : vector<8x32xf32>
    %204 = vector.extract_strided_slice %183 {offsets = [0, 64], sizes = [8, 32], strides = [1, 1]} : vector<8x96xf32> to vector<8x32xf32>
    %205 = vector.extract_strided_slice %181 {offsets = [0, 64], sizes = [8, 32], strides = [1, 1]} : vector<8x96xf32> to vector<8x32xf32>
    %206 = arith.mulf %193, %205 : vector<8x32xf32>
    %207 = arith.addf %204, %206 : vector<8x32xf32>
    %208 = math.tanh %207 : vector<8x32xf32>
    %cst_45 = arith.constant 1.000000e+00 : f32
    %209 = vector.broadcast %cst_45 : f32 to vector<8x32xf32>
    %210 = arith.subf %209, %203 : vector<8x32xf32>
    %211 = arith.mulf %210, %208 : vector<8x32xf32>
    %212 = arith.mulf %203, %178 : vector<8x32xf32>
    %213 = arith.addf %211, %212 : vector<8x32xf32>
    %cst_46 = arith.constant dense<0.000000e+00> : vector<8x96xf32>
    %214 = tpu.matmul %213, %136, %cst_46 {dimension_numbers = #tpu.dot_dimension_numbers<[1], [0], [0], [1], [0, 0, 1, 1], [], []>} : vector<8x32xf32>, vector<32x96xf32>, vector<8x96xf32> -> vector<8x96xf32>
    %215 = vector.broadcast %138 : vector<1x96xf32> to vector<8x96xf32>
    %216 = arith.addf %214, %215 : vector<8x96xf32>
    %217 = vector.extract_strided_slice %142 {offsets = [2, 0, 0], sizes = [1, 8, 96], strides = [1, 1, 1]} : vector<8x8x96xf32> to vector<1x8x96xf32>
    %218 = vector.shape_cast %217 : vector<1x8x96xf32> to vector<8x96xf32>
    %219 = vector.extract_strided_slice %218 {offsets = [0, 0], sizes = [8, 32], strides = [1, 1]} : vector<8x96xf32> to vector<8x32xf32>
    %220 = vector.extract_strided_slice %216 {offsets = [0, 0], sizes = [8, 32], strides = [1, 1]} : vector<8x96xf32> to vector<8x32xf32>
    %221 = arith.addf %219, %220 : vector<8x32xf32>
    %cst_47 = arith.constant 5.000000e-01 : f32
    %222 = vector.broadcast %cst_47 : f32 to vector<8x32xf32>
    %223 = arith.mulf %222, %221 : vector<8x32xf32>
    %224 = math.tanh %223 : vector<8x32xf32>
    %cst_48 = arith.constant 5.000000e-01 : f32
    %225 = vector.broadcast %cst_48 : f32 to vector<8x32xf32>
    %226 = arith.mulf %225, %224 : vector<8x32xf32>
    %cst_49 = arith.constant 5.000000e-01 : f32
    %227 = vector.broadcast %cst_49 : f32 to vector<8x32xf32>
    %228 = arith.addf %226, %227 : vector<8x32xf32>
    %229 = vector.extract_strided_slice %218 {offsets = [0, 32], sizes = [8, 32], strides = [1, 1]} : vector<8x96xf32> to vector<8x32xf32>
    %230 = vector.extract_strided_slice %216 {offsets = [0, 32], sizes = [8, 32], strides = [1, 1]} : vector<8x96xf32> to vector<8x32xf32>
    %231 = arith.addf %229, %230 : vector<8x32xf32>
    %cst_50 = arith.constant 5.000000e-01 : f32
    %232 = vector.broadcast %cst_50 : f32 to vector<8x32xf32>
    %233 = arith.mulf %232, %231 : vector<8x32xf32>
    %234 = math.tanh %233 : vector<8x32xf32>
    %cst_51 = arith.constant 5.000000e-01 : f32
    %235 = vector.broadcast %cst_51 : f32 to vector<8x32xf32>
    %236 = arith.mulf %235, %234 : vector<8x32xf32>
    %cst_52 = arith.constant 5.000000e-01 : f32
    %237 = vector.broadcast %cst_52 : f32 to vector<8x32xf32>
    %238 = arith.addf %236, %237 : vector<8x32xf32>
    %239 = vector.extract_strided_slice %218 {offsets = [0, 64], sizes = [8, 32], strides = [1, 1]} : vector<8x96xf32> to vector<8x32xf32>
    %240 = vector.extract_strided_slice %216 {offsets = [0, 64], sizes = [8, 32], strides = [1, 1]} : vector<8x96xf32> to vector<8x32xf32>
    %241 = arith.mulf %228, %240 : vector<8x32xf32>
    %242 = arith.addf %239, %241 : vector<8x32xf32>
    %243 = math.tanh %242 : vector<8x32xf32>
    %cst_53 = arith.constant 1.000000e+00 : f32
    %244 = vector.broadcast %cst_53 : f32 to vector<8x32xf32>
    %245 = arith.subf %244, %238 : vector<8x32xf32>
    %246 = arith.mulf %245, %243 : vector<8x32xf32>
    %247 = arith.mulf %238, %213 : vector<8x32xf32>
    %248 = arith.addf %246, %247 : vector<8x32xf32>
    %cst_54 = arith.constant dense<0.000000e+00> : vector<8x96xf32>
    %249 = tpu.matmul %248, %136, %cst_54 {dimension_numbers = #tpu.dot_dimension_numbers<[1], [0], [0], [1], [0, 0, 1, 1], [], []>} : vector<8x32xf32>, vector<32x96xf32>, vector<8x96xf32> -> vector<8x96xf32>
    %250 = vector.broadcast %138 : vector<1x96xf32> to vector<8x96xf32>
    %251 = arith.addf %249, %250 : vector<8x96xf32>
    %252 = vector.extract_strided_slice %142 {offsets = [3, 0, 0], sizes = [1, 8, 96], strides = [1, 1, 1]} : vector<8x8x96xf32> to vector<1x8x96xf32>
    %253 = vector.shape_cast %252 : vector<1x8x96xf32> to vector<8x96xf32>
    %254 = vector.extract_strided_slice %253 {offsets = [0, 0], sizes = [8, 32], strides = [1, 1]} : vector<8x96xf32> to vector<8x32xf32>
    %255 = vector.extract_strided_slice %251 {offsets = [0, 0], sizes = [8, 32], strides = [1, 1]} : vector<8x96xf32> to vector<8x32xf32>
    %256 = arith.addf %254, %255 : vector<8x32xf32>
    %cst_55 = arith.constant 5.000000e-01 : f32
    %257 = vector.broadcast %cst_55 : f32 to vector<8x32xf32>
    %258 = arith.mulf %257, %256 : vector<8x32xf32>
    %259 = math.tanh %258 : vector<8x32xf32>
    %cst_56 = arith.constant 5.000000e-01 : f32
    %260 = vector.broadcast %cst_56 : f32 to vector<8x32xf32>
    %261 = arith.mulf %260, %259 : vector<8x32xf32>
    %cst_57 = arith.constant 5.000000e-01 : f32
    %262 = vector.broadcast %cst_57 : f32 to vector<8x32xf32>
    %263 = arith.addf %261, %262 : vector<8x32xf32>
    %264 = vector.extract_strided_slice %253 {offsets = [0, 32], sizes = [8, 32], strides = [1, 1]} : vector<8x96xf32> to vector<8x32xf32>
    %265 = vector.extract_strided_slice %251 {offsets = [0, 32], sizes = [8, 32], strides = [1, 1]} : vector<8x96xf32> to vector<8x32xf32>
    %266 = arith.addf %264, %265 : vector<8x32xf32>
    %cst_58 = arith.constant 5.000000e-01 : f32
    %267 = vector.broadcast %cst_58 : f32 to vector<8x32xf32>
    %268 = arith.mulf %267, %266 : vector<8x32xf32>
    %269 = math.tanh %268 : vector<8x32xf32>
    %cst_59 = arith.constant 5.000000e-01 : f32
    %270 = vector.broadcast %cst_59 : f32 to vector<8x32xf32>
    %271 = arith.mulf %270, %269 : vector<8x32xf32>
    %cst_60 = arith.constant 5.000000e-01 : f32
    %272 = vector.broadcast %cst_60 : f32 to vector<8x32xf32>
    %273 = arith.addf %271, %272 : vector<8x32xf32>
    %274 = vector.extract_strided_slice %253 {offsets = [0, 64], sizes = [8, 32], strides = [1, 1]} : vector<8x96xf32> to vector<8x32xf32>
    %275 = vector.extract_strided_slice %251 {offsets = [0, 64], sizes = [8, 32], strides = [1, 1]} : vector<8x96xf32> to vector<8x32xf32>
    %276 = arith.mulf %263, %275 : vector<8x32xf32>
    %277 = arith.addf %274, %276 : vector<8x32xf32>
    %278 = math.tanh %277 : vector<8x32xf32>
    %cst_61 = arith.constant 1.000000e+00 : f32
    %279 = vector.broadcast %cst_61 : f32 to vector<8x32xf32>
    %280 = arith.subf %279, %273 : vector<8x32xf32>
    %281 = arith.mulf %280, %278 : vector<8x32xf32>
    %282 = arith.mulf %273, %248 : vector<8x32xf32>
    %283 = arith.addf %281, %282 : vector<8x32xf32>
    %cst_62 = arith.constant dense<0.000000e+00> : vector<8x96xf32>
    %284 = tpu.matmul %283, %136, %cst_62 {dimension_numbers = #tpu.dot_dimension_numbers<[1], [0], [0], [1], [0, 0, 1, 1], [], []>} : vector<8x32xf32>, vector<32x96xf32>, vector<8x96xf32> -> vector<8x96xf32>
    %285 = vector.broadcast %138 : vector<1x96xf32> to vector<8x96xf32>
    %286 = arith.addf %284, %285 : vector<8x96xf32>
    %287 = vector.extract_strided_slice %142 {offsets = [4, 0, 0], sizes = [1, 8, 96], strides = [1, 1, 1]} : vector<8x8x96xf32> to vector<1x8x96xf32>
    %288 = vector.shape_cast %287 : vector<1x8x96xf32> to vector<8x96xf32>
    %289 = vector.extract_strided_slice %288 {offsets = [0, 0], sizes = [8, 32], strides = [1, 1]} : vector<8x96xf32> to vector<8x32xf32>
    %290 = vector.extract_strided_slice %286 {offsets = [0, 0], sizes = [8, 32], strides = [1, 1]} : vector<8x96xf32> to vector<8x32xf32>
    %291 = arith.addf %289, %290 : vector<8x32xf32>
    %cst_63 = arith.constant 5.000000e-01 : f32
    %292 = vector.broadcast %cst_63 : f32 to vector<8x32xf32>
    %293 = arith.mulf %292, %291 : vector<8x32xf32>
    %294 = math.tanh %293 : vector<8x32xf32>
    %cst_64 = arith.constant 5.000000e-01 : f32
    %295 = vector.broadcast %cst_64 : f32 to vector<8x32xf32>
    %296 = arith.mulf %295, %294 : vector<8x32xf32>
    %cst_65 = arith.constant 5.000000e-01 : f32
    %297 = vector.broadcast %cst_65 : f32 to vector<8x32xf32>
    %298 = arith.addf %296, %297 : vector<8x32xf32>
    %299 = vector.extract_strided_slice %288 {offsets = [0, 32], sizes = [8, 32], strides = [1, 1]} : vector<8x96xf32> to vector<8x32xf32>
    %300 = vector.extract_strided_slice %286 {offsets = [0, 32], sizes = [8, 32], strides = [1, 1]} : vector<8x96xf32> to vector<8x32xf32>
    %301 = arith.addf %299, %300 : vector<8x32xf32>
    %cst_66 = arith.constant 5.000000e-01 : f32
    %302 = vector.broadcast %cst_66 : f32 to vector<8x32xf32>
    %303 = arith.mulf %302, %301 : vector<8x32xf32>
    %304 = math.tanh %303 : vector<8x32xf32>
    %cst_67 = arith.constant 5.000000e-01 : f32
    %305 = vector.broadcast %cst_67 : f32 to vector<8x32xf32>
    %306 = arith.mulf %305, %304 : vector<8x32xf32>
    %cst_68 = arith.constant 5.000000e-01 : f32
    %307 = vector.broadcast %cst_68 : f32 to vector<8x32xf32>
    %308 = arith.addf %306, %307 : vector<8x32xf32>
    %309 = vector.extract_strided_slice %288 {offsets = [0, 64], sizes = [8, 32], strides = [1, 1]} : vector<8x96xf32> to vector<8x32xf32>
    %310 = vector.extract_strided_slice %286 {offsets = [0, 64], sizes = [8, 32], strides = [1, 1]} : vector<8x96xf32> to vector<8x32xf32>
    %311 = arith.mulf %298, %310 : vector<8x32xf32>
    %312 = arith.addf %309, %311 : vector<8x32xf32>
    %313 = math.tanh %312 : vector<8x32xf32>
    %cst_69 = arith.constant 1.000000e+00 : f32
    %314 = vector.broadcast %cst_69 : f32 to vector<8x32xf32>
    %315 = arith.subf %314, %308 : vector<8x32xf32>
    %316 = arith.mulf %315, %313 : vector<8x32xf32>
    %317 = arith.mulf %308, %283 : vector<8x32xf32>
    %318 = arith.addf %316, %317 : vector<8x32xf32>
    %cst_70 = arith.constant dense<0.000000e+00> : vector<8x96xf32>
    %319 = tpu.matmul %318, %136, %cst_70 {dimension_numbers = #tpu.dot_dimension_numbers<[1], [0], [0], [1], [0, 0, 1, 1], [], []>} : vector<8x32xf32>, vector<32x96xf32>, vector<8x96xf32> -> vector<8x96xf32>
    %320 = vector.broadcast %138 : vector<1x96xf32> to vector<8x96xf32>
    %321 = arith.addf %319, %320 : vector<8x96xf32>
    %322 = vector.extract_strided_slice %142 {offsets = [5, 0, 0], sizes = [1, 8, 96], strides = [1, 1, 1]} : vector<8x8x96xf32> to vector<1x8x96xf32>
    %323 = vector.shape_cast %322 : vector<1x8x96xf32> to vector<8x96xf32>
    %324 = vector.extract_strided_slice %323 {offsets = [0, 0], sizes = [8, 32], strides = [1, 1]} : vector<8x96xf32> to vector<8x32xf32>
    %325 = vector.extract_strided_slice %321 {offsets = [0, 0], sizes = [8, 32], strides = [1, 1]} : vector<8x96xf32> to vector<8x32xf32>
    %326 = arith.addf %324, %325 : vector<8x32xf32>
    %cst_71 = arith.constant 5.000000e-01 : f32
    %327 = vector.broadcast %cst_71 : f32 to vector<8x32xf32>
    %328 = arith.mulf %327, %326 : vector<8x32xf32>
    %329 = math.tanh %328 : vector<8x32xf32>
    %cst_72 = arith.constant 5.000000e-01 : f32
    %330 = vector.broadcast %cst_72 : f32 to vector<8x32xf32>
    %331 = arith.mulf %330, %329 : vector<8x32xf32>
    %cst_73 = arith.constant 5.000000e-01 : f32
    %332 = vector.broadcast %cst_73 : f32 to vector<8x32xf32>
    %333 = arith.addf %331, %332 : vector<8x32xf32>
    %334 = vector.extract_strided_slice %323 {offsets = [0, 32], sizes = [8, 32], strides = [1, 1]} : vector<8x96xf32> to vector<8x32xf32>
    %335 = vector.extract_strided_slice %321 {offsets = [0, 32], sizes = [8, 32], strides = [1, 1]} : vector<8x96xf32> to vector<8x32xf32>
    %336 = arith.addf %334, %335 : vector<8x32xf32>
    %cst_74 = arith.constant 5.000000e-01 : f32
    %337 = vector.broadcast %cst_74 : f32 to vector<8x32xf32>
    %338 = arith.mulf %337, %336 : vector<8x32xf32>
    %339 = math.tanh %338 : vector<8x32xf32>
    %cst_75 = arith.constant 5.000000e-01 : f32
    %340 = vector.broadcast %cst_75 : f32 to vector<8x32xf32>
    %341 = arith.mulf %340, %339 : vector<8x32xf32>
    %cst_76 = arith.constant 5.000000e-01 : f32
    %342 = vector.broadcast %cst_76 : f32 to vector<8x32xf32>
    %343 = arith.addf %341, %342 : vector<8x32xf32>
    %344 = vector.extract_strided_slice %323 {offsets = [0, 64], sizes = [8, 32], strides = [1, 1]} : vector<8x96xf32> to vector<8x32xf32>
    %345 = vector.extract_strided_slice %321 {offsets = [0, 64], sizes = [8, 32], strides = [1, 1]} : vector<8x96xf32> to vector<8x32xf32>
    %346 = arith.mulf %333, %345 : vector<8x32xf32>
    %347 = arith.addf %344, %346 : vector<8x32xf32>
    %348 = math.tanh %347 : vector<8x32xf32>
    %cst_77 = arith.constant 1.000000e+00 : f32
    %349 = vector.broadcast %cst_77 : f32 to vector<8x32xf32>
    %350 = arith.subf %349, %343 : vector<8x32xf32>
    %351 = arith.mulf %350, %348 : vector<8x32xf32>
    %352 = arith.mulf %343, %318 : vector<8x32xf32>
    %353 = arith.addf %351, %352 : vector<8x32xf32>
    %cst_78 = arith.constant dense<0.000000e+00> : vector<8x96xf32>
    %354 = tpu.matmul %353, %136, %cst_78 {dimension_numbers = #tpu.dot_dimension_numbers<[1], [0], [0], [1], [0, 0, 1, 1], [], []>} : vector<8x32xf32>, vector<32x96xf32>, vector<8x96xf32> -> vector<8x96xf32>
    %355 = vector.broadcast %138 : vector<1x96xf32> to vector<8x96xf32>
    %356 = arith.addf %354, %355 : vector<8x96xf32>
    %357 = vector.extract_strided_slice %142 {offsets = [6, 0, 0], sizes = [1, 8, 96], strides = [1, 1, 1]} : vector<8x8x96xf32> to vector<1x8x96xf32>
    %358 = vector.shape_cast %357 : vector<1x8x96xf32> to vector<8x96xf32>
    %359 = vector.extract_strided_slice %358 {offsets = [0, 0], sizes = [8, 32], strides = [1, 1]} : vector<8x96xf32> to vector<8x32xf32>
    %360 = vector.extract_strided_slice %356 {offsets = [0, 0], sizes = [8, 32], strides = [1, 1]} : vector<8x96xf32> to vector<8x32xf32>
    %361 = arith.addf %359, %360 : vector<8x32xf32>
    %cst_79 = arith.constant 5.000000e-01 : f32
    %362 = vector.broadcast %cst_79 : f32 to vector<8x32xf32>
    %363 = arith.mulf %362, %361 : vector<8x32xf32>
    %364 = math.tanh %363 : vector<8x32xf32>
    %cst_80 = arith.constant 5.000000e-01 : f32
    %365 = vector.broadcast %cst_80 : f32 to vector<8x32xf32>
    %366 = arith.mulf %365, %364 : vector<8x32xf32>
    %cst_81 = arith.constant 5.000000e-01 : f32
    %367 = vector.broadcast %cst_81 : f32 to vector<8x32xf32>
    %368 = arith.addf %366, %367 : vector<8x32xf32>
    %369 = vector.extract_strided_slice %358 {offsets = [0, 32], sizes = [8, 32], strides = [1, 1]} : vector<8x96xf32> to vector<8x32xf32>
    %370 = vector.extract_strided_slice %356 {offsets = [0, 32], sizes = [8, 32], strides = [1, 1]} : vector<8x96xf32> to vector<8x32xf32>
    %371 = arith.addf %369, %370 : vector<8x32xf32>
    %cst_82 = arith.constant 5.000000e-01 : f32
    %372 = vector.broadcast %cst_82 : f32 to vector<8x32xf32>
    %373 = arith.mulf %372, %371 : vector<8x32xf32>
    %374 = math.tanh %373 : vector<8x32xf32>
    %cst_83 = arith.constant 5.000000e-01 : f32
    %375 = vector.broadcast %cst_83 : f32 to vector<8x32xf32>
    %376 = arith.mulf %375, %374 : vector<8x32xf32>
    %cst_84 = arith.constant 5.000000e-01 : f32
    %377 = vector.broadcast %cst_84 : f32 to vector<8x32xf32>
    %378 = arith.addf %376, %377 : vector<8x32xf32>
    %379 = vector.extract_strided_slice %358 {offsets = [0, 64], sizes = [8, 32], strides = [1, 1]} : vector<8x96xf32> to vector<8x32xf32>
    %380 = vector.extract_strided_slice %356 {offsets = [0, 64], sizes = [8, 32], strides = [1, 1]} : vector<8x96xf32> to vector<8x32xf32>
    %381 = arith.mulf %368, %380 : vector<8x32xf32>
    %382 = arith.addf %379, %381 : vector<8x32xf32>
    %383 = math.tanh %382 : vector<8x32xf32>
    %cst_85 = arith.constant 1.000000e+00 : f32
    %384 = vector.broadcast %cst_85 : f32 to vector<8x32xf32>
    %385 = arith.subf %384, %378 : vector<8x32xf32>
    %386 = arith.mulf %385, %383 : vector<8x32xf32>
    %387 = arith.mulf %378, %353 : vector<8x32xf32>
    %388 = arith.addf %386, %387 : vector<8x32xf32>
    %cst_86 = arith.constant dense<0.000000e+00> : vector<8x96xf32>
    %389 = tpu.matmul %388, %136, %cst_86 {dimension_numbers = #tpu.dot_dimension_numbers<[1], [0], [0], [1], [0, 0, 1, 1], [], []>} : vector<8x32xf32>, vector<32x96xf32>, vector<8x96xf32> -> vector<8x96xf32>
    %390 = vector.broadcast %138 : vector<1x96xf32> to vector<8x96xf32>
    %391 = arith.addf %389, %390 : vector<8x96xf32>
    %392 = vector.extract_strided_slice %142 {offsets = [7, 0, 0], sizes = [1, 8, 96], strides = [1, 1, 1]} : vector<8x8x96xf32> to vector<1x8x96xf32>
    %393 = vector.shape_cast %392 : vector<1x8x96xf32> to vector<8x96xf32>
    %394 = vector.extract_strided_slice %393 {offsets = [0, 0], sizes = [8, 32], strides = [1, 1]} : vector<8x96xf32> to vector<8x32xf32>
    %395 = vector.extract_strided_slice %391 {offsets = [0, 0], sizes = [8, 32], strides = [1, 1]} : vector<8x96xf32> to vector<8x32xf32>
    %396 = arith.addf %394, %395 : vector<8x32xf32>
    %cst_87 = arith.constant 5.000000e-01 : f32
    %397 = vector.broadcast %cst_87 : f32 to vector<8x32xf32>
    %398 = arith.mulf %397, %396 : vector<8x32xf32>
    %399 = math.tanh %398 : vector<8x32xf32>
    %cst_88 = arith.constant 5.000000e-01 : f32
    %400 = vector.broadcast %cst_88 : f32 to vector<8x32xf32>
    %401 = arith.mulf %400, %399 : vector<8x32xf32>
    %cst_89 = arith.constant 5.000000e-01 : f32
    %402 = vector.broadcast %cst_89 : f32 to vector<8x32xf32>
    %403 = arith.addf %401, %402 : vector<8x32xf32>
    %404 = vector.extract_strided_slice %393 {offsets = [0, 32], sizes = [8, 32], strides = [1, 1]} : vector<8x96xf32> to vector<8x32xf32>
    %405 = vector.extract_strided_slice %391 {offsets = [0, 32], sizes = [8, 32], strides = [1, 1]} : vector<8x96xf32> to vector<8x32xf32>
    %406 = arith.addf %404, %405 : vector<8x32xf32>
    %cst_90 = arith.constant 5.000000e-01 : f32
    %407 = vector.broadcast %cst_90 : f32 to vector<8x32xf32>
    %408 = arith.mulf %407, %406 : vector<8x32xf32>
    %409 = math.tanh %408 : vector<8x32xf32>
    %cst_91 = arith.constant 5.000000e-01 : f32
    %410 = vector.broadcast %cst_91 : f32 to vector<8x32xf32>
    %411 = arith.mulf %410, %409 : vector<8x32xf32>
    %cst_92 = arith.constant 5.000000e-01 : f32
    %412 = vector.broadcast %cst_92 : f32 to vector<8x32xf32>
    %413 = arith.addf %411, %412 : vector<8x32xf32>
    %414 = vector.extract_strided_slice %393 {offsets = [0, 64], sizes = [8, 32], strides = [1, 1]} : vector<8x96xf32> to vector<8x32xf32>
    %415 = vector.extract_strided_slice %391 {offsets = [0, 64], sizes = [8, 32], strides = [1, 1]} : vector<8x96xf32> to vector<8x32xf32>
    %416 = arith.mulf %403, %415 : vector<8x32xf32>
    %417 = arith.addf %414, %416 : vector<8x32xf32>
    %418 = math.tanh %417 : vector<8x32xf32>
    %cst_93 = arith.constant 1.000000e+00 : f32
    %419 = vector.broadcast %cst_93 : f32 to vector<8x32xf32>
    %420 = arith.subf %419, %413 : vector<8x32xf32>
    %421 = arith.mulf %420, %418 : vector<8x32xf32>
    %422 = arith.mulf %413, %388 : vector<8x32xf32>
    %423 = arith.addf %421, %422 : vector<8x32xf32>
    %c0_94 = arith.constant 0 : index
    %c0_95 = arith.constant 0 : index
    %c0_96 = arith.constant 0 : index
    %424 = vector.load %arg13[%c0_94, %c0_95, %c0_96] : memref<1x8x32xf32, #tpu.memory_space<vmem>>, vector<1x8x32xf32>
    %425 = vector.shape_cast %424 : vector<1x8x32xf32> to vector<8x32xf32>
    %426 = vector.shape_cast %423 : vector<8x32xf32> to vector<1x8x32xf32>
    tpu.vector_store %arg13[%c0_94, %c0_95, %c0_96], %426 {strides = array<i32>} : memref<1x8x32xf32, #tpu.memory_space<vmem>>, vector<1x8x32xf32>,
    %427 = vector.shape_cast %178 : vector<8x32xf32> to vector<1x8x32xf32>
    %428 = vector.shape_cast %213 : vector<8x32xf32> to vector<1x8x32xf32>
    %429 = vector.shape_cast %248 : vector<8x32xf32> to vector<1x8x32xf32>
    %430 = vector.shape_cast %283 : vector<8x32xf32> to vector<1x8x32xf32>
    %431 = vector.shape_cast %318 : vector<8x32xf32> to vector<1x8x32xf32>
    %432 = vector.shape_cast %353 : vector<8x32xf32> to vector<1x8x32xf32>
    %433 = vector.shape_cast %388 : vector<8x32xf32> to vector<1x8x32xf32>
    %434 = vector.shape_cast %423 : vector<8x32xf32> to vector<1x8x32xf32>
    %435 = tpu.concatenate %427, %428, %429, %430, %431, %432, %433, %434 in 0 : vector<1x8x32xf32>, vector<1x8x32xf32>, vector<1x8x32xf32>, vector<1x8x32xf32>, vector<1x8x32xf32>, vector<1x8x32xf32>, vector<1x8x32xf32>, vector<1x8x32xf32> -> vector<8x8x32xf32>
    %c0_97 = arith.constant 0 : index
    %c0_98 = arith.constant 0 : index
    %436 = vector.load %arg10[%c0_97, %c0_98] : memref<1x32xf32, #tpu.memory_space<vmem>>, vector<1x32xf32>
    %437 = vector.shape_cast %436 : vector<1x32xf32> to vector<1x1x32xf32>
    %438 = vector.broadcast %437 : vector<1x1x32xf32> to vector<8x8x32xf32>
    %439 = arith.mulf %435, %438 : vector<8x8x32xf32>
    %cst_99 = arith.constant dense<0.000000e+00> : vector<8x8xf32>
    %440 = vector.multi_reduction <add>, %439, %cst_99 [2] : vector<8x8x32xf32> to vector<8x8xf32>
    %c0_100 = arith.constant 0 : index
    %c0_101 = arith.constant 0 : index
    %441 = vector.load %arg11[%c0_100, %c0_101] : memref<1x1xf32, #tpu.memory_space<vmem>>, vector<1x1xf32>
    %442 = vector.broadcast %441 : vector<1x1xf32> to vector<8x8xf32>
    %443 = arith.addf %440, %442 : vector<8x8xf32>
    %cst_102 = arith.constant 0.000000e+00 : f32
    %444 = vector.broadcast %cst_102 : f32 to vector<8x8xf32>
    %445 = arith.maximumf %443, %444 : vector<8x8xf32>
    %c0_103 = arith.constant 0 : index
    %c0_104 = arith.constant 0 : index
    %446 = vector.load %arg12[%c0_103, %c0_104] : memref<8x8xf32, #tpu.memory_space<vmem>>, vector<8x8xf32>
    tpu.vector_store %arg12[%c0_103, %c0_104], %445 {strides = array<i32>} : memref<8x8xf32, #tpu.memory_space<vmem>>, vector<8x8xf32>,
    return
  }
}

</mosaic_0001>

<bundles_post_ra>
// kernel: tpu_custom_call.1
= control target key start
LH: loop header
LB: loop body
LE: loop exit
PB: predicated region body
PF: predicated region fallthrough
CT: control target
= control target key end

     0   :  { %s3274_s0 = inlined_call_operand.vmem [shape: f32[8,1,16], index: 0, kind: input, shape index: {}]   ;;  %s3275_s1 = inlined_call_operand.vmem [shape: f32[3,1,4,1], index: 1, kind: input, shape index: {}]   ;;  %s3276_s2 = inlined_call_operand.vmem [shape: f32[1,4,1], index: 2, kind: input, shape index: {}]   ;;  %s3277_s3 = inlined_call_operand.vmem [shape: f32[3,4,8,1], index: 3, kind: input, shape index: {}]   ;;  %s3278_s4 = inlined_call_operand.vmem [shape: f32[1,8,1], index: 4, kind: input, shape index: {}]   ;;  %s3279_s5 = inlined_call_operand.vmem [shape: f32[8,32], index: 5, kind: input, shape index: {}]   ;;  %s3280_s6 = inlined_call_operand.vmem [shape: f32[12,96], index: 6, kind: input, shape index: {}]   ;;  %s3281_s7 = inlined_call_operand.vmem [shape: f32[32,96], index: 7, kind: input, shape index: {}]   ;;  %s3282_s8 = inlined_call_operand.vmem [shape: f32[1,96], index: 8, kind: input, shape index: {}]   ;;  %s3283_s9 = inlined_call_operand.vmem [shape: f32[1,96], index: 9, kind: input, shape index: {}]   ;;  %s3284_s10 = inlined_call_operand.vmem [shape: f32[1,32], index: 10, kind: input, shape index: {}]   ;;  %s3285_s11 = inlined_call_operand.<no memory space> [shape: f32[1,1], index: 11, kind: input, shape index: {}]   ;;  %s3286_s12 = inlined_call_operand.hbm [shape: f32[8,8], index: 12, kind: output, shape index: {0}]   ;;  %s3287_s13 = inlined_call_operand.hbm [shape: f32[1,8,32], index: 13, kind: output, shape index: {1}]  }
   0x1   :  { %v19_v0 = vstv %s3285_s11 }
   0x2   :  { %20 = vst [vmem:[#allocation2] sm:$0x1] %v19_v0 }
   0x3   :  { %21 = vsyncpa [#allocation4], 0  ;;  %v56_v1 = vld [vmem:[%s3275_s1 + $0x4] sm:$0xf]  ;;  %v2342_v2 = vmov 0  }
   0x4   :  { %2258 = vset.pattern.permute.xlu0 %v2342_v2  ;;  %2259 = vset.pattern.permute.xlu1 %v2342_v2  ;;  %v55_v3 = vld [vmem:[%s3275_s1] sm:$0xf]  ;;  %v57_v4 = vld [vmem:[%s3275_s1 + $0x8] sm:$0xf] }
   0x5   :  { %130 = vperm.xlu0 %2258, %v56_v1   ;;  %109 = vperm.xlu1 %2259, %v55_v3   ;;  %v58_v5 = vld [vmem:[%s3276_s2] sm:$0xf] }
   0x6   :  { %22 = vsyncpa [#allocation6], 0  ;;  %v2440_v6 = vld [vmem:[%s3274_s0 + $0x1] ss:$0 sm:$0xff]  ;;  %v2445_v7 = vld [vmem:[%s3274_s0] ss:$0 sm:$0xff]  ;;  %v268_v43 = vlaneseq }
   0x7   :  { %s2343_s1 = smov 127   ;;  %s2344_s2 = smov 126   ;;  %v260_v14 = vld [vmem:[%s3277_s3 + $0x28] sm:$0xff]  ;;  %v259_v15 = vld [vmem:[%s3277_s3 + $0x20] sm:$0xff]  ;;  %v262_v16 = vld [vmem:[%s3277_s3 + $0x38] sm:$0xff]  ;;  %v2345_v28 = vmov 0.0  }
   0x8   :  { %v261_v17 = vld [vmem:[%s3277_s3 + $0x30] sm:$0xff]  ;;  %v264_v18 = vld [vmem:[%s3277_s3 + $0x48] sm:$0xff]  ;;  %v263_v19 = vld [vmem:[%s3277_s3 + $0x40] sm:$0xff]  ;;  %2160 = vmatprep.subr.mxu1 %v2345_v28  ;;  %vm2346_vm0 = vmmov 0   ;;  %vm1080_vm1 = vcmask 261120   ;;  %v2561_v48 = vshrl.u32 %v268_v43, 7 }
   0x9   :  { %183 = vperm.xlu0 %2258, %v57_v4   ;;  %236 = vperm.xlu1 %2259, %v58_v5   ;;  %v266_v20 = vld [vmem:[%s3277_s3 + $0x58] sm:$0xff]  ;;  %v265_v21 = vld [vmem:[%s3277_s3 + $0x50] sm:$0xff]  ;;  %v256_v22 = vld [vmem:[%s3277_s3 + $0x8] sm:$0xff]  ;;  %vm964_vm2 = vcmask 1043456   ;;  %s2347_s23 = smov 64   ;;  %vm939_vm3 = vcmask 97280  }
   0xa   :  { %v255_v23 = vld [vmem:[%s3277_s3] sm:$0xff]  ;;  %v258_v24 = vld [vmem:[%s3277_s3 + $0x18] sm:$0xff]  ;;  %v257_v25 = vld [vmem:[%s3277_s3 + $0x10] sm:$0xff]  ;;  %2168 = vmatprep.mubr.msk.f32.mxu1 %vm2346_vm0, %v2345_v28  ;;  %v2564_v51 = vsub.s32 0, %v2561_v48  ;;  %v2569_v54 = vsub.s32 1, %v2561_v48  ;;  %v2582_v61 = vsub.s32 2, %v2561_v48 }
   0xb   :  { %v267_v26 = vld [vmem:[%s3278_s4] sm:$0xff]  ;;  %v2505_v27 = vld [vmem:[%s3281_s7 + $0x18] sm:$0xff]  ;;  %v2511_v29 = vld [vmem:[%s3281_s7 + $0x10] sm:$0xff]  ;;  %v2595_v4 = vsub.s32 3, %v2561_v48  ;;  %s2348_s26 = smov 32   ;;  %s2349_s27 = smov 96  }
   0xc   :  { %2161 = vmatpush3.msra.mxu1 %v2505_v27  ;;  %v2520_v30 = vld [vmem:[%s3281_s7 + $0x8] sm:$0xff]  ;;  %v2527_v31 = vld [vmem:[%s3281_s7] sm:$0xff]  ;;  %vm2020_vm4 = vcmask 1041409   ;;  %vm2022_vm5 = vcmask 1042434   ;;  %vm2024_vm6 = vcmask 1043459   ;;  %vm2026_vm7 = vcmask 1044484  }
   0xd   :  { %2162 = vmatprep.subr.mxu1 %v2345_v28  ;;  %v2533_v32 = vld [vmem:[%s3279_s5] sm:$0xff]  ;;  %vm2028_vm8 = vcmask 1045509   ;;  %vm2030_vm9 = vcmask 1046534   ;;  %vm2032_vm10 = vcmask 1047559   ;;  %vm2035_vm11 = vcmask 64512  }
   0xe   :  { %2163 = vmatpush3.msra.mxu1 %v2511_v29 }
   0xf   :  { %2164 = vmatprep.subr.mxu1 %v2345_v28 }
  0x10   :  { %2165 = vmatpush3.msra.mxu1 %v2520_v30 }
  0x11   :  { %2166 = vmatprep.subr.mxu1 %v2345_v28 }
  0x12   :  { %2167 = vmatpush3.msra.mxu1 %v2527_v31 }
  0x13   :  { %2169 = vmatmul.mubr.msk.f32.vlgmr.msra.gmra.mxu1 %vm1080_vm1, %v2533_v32  ;;  %2171 = vmatprep.subr.mxu1 %v2345_v28 }
  0x14   :  { %2172 = vmatpush3.msra.mxu1 %v2505_v27  ;;  %2179 = vmatprep.mubr.msk.f32.mxu1 %vm2346_vm0, %v2345_v28 }
  0x15   :  { %2173 = vmatprep.subr.mxu1 %v2345_v28 }
  0x16   :  { %2174 = vmatpush3.msra.mxu1 %v2511_v29 }
  0x17   :  { %2175 = vmatprep.subr.mxu1 %v2345_v28 }
  0x18   :  { %2176 = vmatpush3.msra.mxu1 %v2520_v30 }
  0x19   :  { %2177 = vmatprep.subr.mxu1 %v2345_v28 }
  0x1a   :  { %2178 = vmatpush3.msra.mxu1 %v2527_v31 }
  0x1b   :  { %2193 = vmatprep.subr.mxu1 %v2345_v28 }
  0x80   :  { %v2447_v8 = vpop.permute.xlu0 %130  ;;  %v2550_v33 = vpop.permute.xlu1 %109 }
  0x81   :  { %v134_v9 = vmul.f32 %v2440_v6, %v2447_v8  ;;  %v133_v10 = vmul.f32 %v2445_v7, %v2447_v8  ;;  %v113_v35 = vmul.f32 %v2440_v6, %v2550_v33  ;;  %v112_v36 = vmul.f32 %v2445_v7, %v2550_v33 }
  0x83   :  { %151 = vrot.lane.b32.xlu1 %v134_v9, %s2343_s1  ;;  %149 = vrot.lane.b32.xlu0 %v133_v10, %s2343_s1 }
  0x84   :  { %v2455_v11 = vpop.permute.xlu0 %183  ;;  %v2552_v34 = vpop.permute.xlu1 %236 }
  0x85   :  { %v187_v12 = vmul.f32 %v2440_v6, %v2455_v11  ;;  %v186_v13 = vmul.f32 %v2445_v7, %v2455_v11 }
  0x87   :  { %204 = vrot.lane.b32.xlu1 %v187_v12, %s2344_s2  ;;  %202 = vrot.lane.b32.xlu0 %v186_v13, %s2344_s2 }
  0x8b   :  { %535 = vperm.xlu1 %2259, %v260_v14   ;;  %482 = vperm.xlu0 %2258, %v259_v15  }
  0x8f   :  { %641 = vperm.xlu1 %2259, %v262_v16   ;;  %588 = vperm.xlu0 %2258, %v261_v17  }
  0x93   :  { %747 = vperm.xlu1 %2259, %v264_v18   ;;  %694 = vperm.xlu0 %2258, %v263_v19  }
  0x97   :  { %853 = vperm.xlu1 %2259, %v266_v20   ;;  %800 = vperm.xlu0 %2258, %v265_v21  }
  0x9b   :  { %355 = vperm.xlu1 %2259, %v256_v22   ;;  %302 = vperm.xlu0 %2258, %v255_v23  }
  0x9f   :  { %461 = vperm.xlu1 %2259, %v258_v24   ;;  %408 = vperm.xlu0 %2258, %v257_v25  }
  0xa3   :  { %906 = vperm.xlu0 %2258, %v267_v26  }
  0xf5   :  { %v152_v37 = vpop.permute.xlu1 %151  ;;  %v150_v38 = vpop.permute.xlu0 %149 }
  0xf6   :  { %v174_v39 = vadd.f32 %v152_v37, %v113_v35  ;;  %v173_v40 = vadd.f32 %v150_v38, %v112_v36 }
  0xf9   :  { %v205_v41 = vpop.permute.xlu1 %204  ;;  %v203_v42 = vpop.permute.xlu0 %202 }
  0xfa   :  { %v227_v44 = vadd.f32 %v205_v41, %v174_v39  ;;  %v226_v45 = vadd.f32 %v203_v42, %v173_v40  ;;  %v926_v41 = vld [vmem:[%s3280_s6 + $0x8] sm:$0xf] }
  0xfb   :  { %2144 = vmatprep.subr.msk.mxu0 %vm964_vm2, %v926_v41 }
  0xfc   :  { %v240_v46 = vadd.f32 %v2552_v34, %v227_v44  ;;  %v239_v47 = vadd.f32 %v2552_v34, %v226_v45  ;;  %2145 = vmatpush3.msk.msra.mxu0 %vm964_vm2, %v926_v41 }
  0xfe   :  { %v248_v49 = vmax.f32 %v240_v46, 0.0  ;;  %v247_v50 = vmax.f32 %v239_v47, 0.0  ;;  %v925_v47 = vld [vmem:[%s3280_s6] sm:$0xff] }
  0xff   :  { %2146 = vmatprep.subr.mxu0 %v925_v47 }
 0x100   :  { %v275_v52 = vrot.slane %v248_v49, %v2564_v51  ;;  %v271_v53 = vrot.slane %v247_v50, %v2564_v51  ;;  %v328_v59 = vrot.slane %v248_v49, %v2569_v54  ;;  %v324_v60 = vrot.slane %v247_v50, %v2569_v54  ;;  %2147 = vmatpush3.msra.mxu0 %v925_v47 }
 0x101   :  { %v381_v2 = vrot.slane %v248_v49, %v2582_v61  ;;  %v377_v3 = vrot.slane %v247_v50, %v2582_v61  ;;  %v434_v10 = vrot.slane %v248_v49, %v2595_v4  ;;  %v430_v12 = vrot.slane %v247_v50, %v2595_v4  ;;  %2182 = vmatprep.subr.mxu0 %v2345_v28 }
 0x106   :  { %v2571_v55 = vpop.permute.xlu1 %535  ;;  %v2573_v56 = vpop.permute.xlu0 %482 }
 0x107   :  { %v486_v57 = vmul.f32 %v2573_v56, %v275_v52  ;;  %v485_v58 = vmul.f32 %v2573_v56, %v271_v53  ;;  %v539_v0 = vmul.f32 %v2571_v55, %v328_v59  ;;  %v538_v1 = vmul.f32 %v2571_v55, %v324_v60 }
 0x109   :  { %503 = vrot.lane.b32.xlu1 %v486_v57, %s2343_s1  ;;  %501 = vrot.lane.b32.xlu0 %v485_v58, %s2343_s1 }
 0x10a   :  { %v2584_v62 = vpop.permute.xlu1 %641  ;;  %v2586_v63 = vpop.permute.xlu0 %588 }
 0x10b   :  { %v592_v7 = vmul.f32 %v2586_v63, %v381_v2  ;;  %v591_v9 = vmul.f32 %v2586_v63, %v377_v3  ;;  %v645_v15 = vmul.f32 %v2584_v62, %v434_v10  ;;  %v644_v16 = vmul.f32 %v2584_v62, %v430_v12 }
 0x10d   :  { %556 = vrot.lane.b32.xlu1 %v539_v0, %s2343_s1  ;;  %554 = vrot.lane.b32.xlu0 %v538_v1, %s2343_s1 }
 0x10e   :  { %v2597_v5 = vpop.permute.xlu1 %747  ;;  %v2599_v6 = vpop.permute.xlu0 %694 }
 0x10f   :  { %v698_v19 = vmul.f32 %v2599_v6, %v275_v52  ;;  %v697_v20 = vmul.f32 %v2599_v6, %v271_v53  ;;  %v751_v37 = vmul.f32 %v2597_v5, %v328_v59  ;;  %v750_v38 = vmul.f32 %v2597_v5, %v324_v60 }
 0x111   :  { %609 = vrot.lane.b32.xlu1 %v592_v7, %s2343_s1  ;;  %607 = vrot.lane.b32.xlu0 %v591_v9, %s2343_s1 }
 0x112   :  { %v2607_v13 = vpop.permute.xlu1 %853  ;;  %v2609_v14 = vpop.permute.xlu0 %800 }
 0x113   :  { %v803_v49 = vmul.f32 %v2609_v14, %v377_v3  ;;  %v804_v50 = vmul.f32 %v2609_v14, %v381_v2  ;;  %v856_v57 = vmul.f32 %v2607_v13, %v430_v12  ;;  %v857_v58 = vmul.f32 %v2607_v13, %v434_v10 }
 0x115   :  { %662 = vrot.lane.b32.xlu1 %v645_v15, %s2343_s1  ;;  %660 = vrot.lane.b32.xlu0 %v644_v16, %s2343_s1 }
 0x116   :  { %v2615_v17 = vpop.permute.xlu1 %355  ;;  %v2617_v18 = vpop.permute.xlu0 %302 }
 0x117   :  { %v359_v21 = vmul.f32 %v2615_v17, %v328_v59  ;;  %v306_v22 = vmul.f32 %v2617_v18, %v275_v52  ;;  %v358_v23 = vmul.f32 %v2615_v17, %v324_v60  ;;  %v305_v24 = vmul.f32 %v2617_v18, %v271_v53  ;;  %v2657_v59 = vld [vmem:[%s3283_s9] ss:$0 sm:$0xff]  ;;  %v1150_v60 = vpop.f32.mrf.mxu1 }
 0x118   :  { %v1151_v0 = vadd.f32 %v2657_v59, %v1150_v60 }
 0x119   :  { %715 = vrot.lane.b32.xlu1 %v698_v19, %s2344_s2  ;;  %713 = vrot.lane.b32.xlu0 %v697_v20, %s2344_s2  ;;  %v367_v25 = vadd.f32 %v359_v21, %v306_v22  ;;  %v366_v26 = vadd.f32 %v358_v23, %v305_v24  ;;  %v2170_v1 = vpop.f32.mrf.mxu1 }
 0x11a   :  { %v2627_v35 = vpop.permute.xlu1 %461  ;;  %v2629_v36 = vpop.permute.xlu0 %408 }
 0x11b   :  { %v412_v39 = vmul.f32 %v2629_v36, %v381_v2  ;;  %v411_v40 = vmul.f32 %v2629_v36, %v377_v3  ;;  %v465_v42 = vmul.f32 %v2627_v35, %v434_v10  ;;  %v464_v45 = vmul.f32 %v2627_v35, %v430_v12 }
 0x11d   :  { %768 = vrot.lane.b32.xlu1 %v751_v37, %s2344_s2  ;;  %766 = vrot.lane.b32.xlu0 %v750_v38, %s2344_s2  ;;  %v420_v44 = vadd.f32 %v412_v39, %v367_v25  ;;  %v419_v46 = vadd.f32 %v411_v40, %v366_v26 }
 0x11e   :  { %v2661_v2 = vpop.permute.xlu0 %906 }
 0x11f   :  { %v473_v52 = vadd.f32 %v465_v42, %v420_v44  ;;  %v472_v53 = vadd.f32 %v464_v45, %v419_v46 }
 0x121   :  { %819 = vrot.lane.b32.xlu1 %v803_v49, %s2344_s2  ;;  %821 = vrot.lane.b32.xlu0 %v804_v50, %s2344_s2 }
 0x125   :  { %872 = vrot.lane.b32.xlu1 %v856_v57, %s2344_s2  ;;  %874 = vrot.lane.b32.xlu0 %v857_v58, %s2344_s2 }
 0x129   :  { %1160 = vrot.lane.b32.xlu1 %v1151_v0, %s2347_s23 }
 0x17b   :  { %v504_v3 = vpop.permute.xlu1 %503  ;;  %v502_v7 = vpop.permute.xlu0 %501 }
 0x17c   :  { %v526_v20 = vadd.f32 %v504_v3, %v473_v52  ;;  %v525_v21 = vadd.f32 %v502_v7, %v472_v53 }
 0x17f   :  { %v557_v9 = vpop.permute.xlu1 %556  ;;  %v555_v10 = vpop.permute.xlu0 %554 }
 0x180   :  { %v579_v24 = vadd.f32 %v557_v9, %v526_v20  ;;  %v578_v25 = vadd.f32 %v555_v10, %v525_v21 }
 0x183   :  { %v610_v12 = vpop.permute.xlu1 %609  ;;  %v608_v15 = vpop.permute.xlu0 %607 }
 0x184   :  { %v632_v26 = vadd.f32 %v610_v12, %v579_v24  ;;  %v631_v37 = vadd.f32 %v608_v15, %v578_v25  ;;  %v2678_v12 = vld [vmem:[%s3282_s8] ss:$0 sm:$0xff] }
 0x187   :  { %v663_v16 = vpop.permute.xlu1 %662  ;;  %v661_v19 = vpop.permute.xlu0 %660 }
 0x188   :  { %v685_v40 = vadd.f32 %v663_v16, %v632_v26  ;;  %v684_v41 = vadd.f32 %v661_v19, %v631_v37 }
 0x18b   :  { %v716_v22 = vpop.permute.xlu1 %715  ;;  %v714_v23 = vpop.permute.xlu0 %713 }
 0x18c   :  { %v738_v42 = vadd.f32 %v716_v22, %v685_v40  ;;  %v737_v44 = vadd.f32 %v714_v23, %v684_v41 }
 0x18f   :  { %v769_v38 = vpop.permute.xlu1 %768  ;;  %v767_v39 = vpop.permute.xlu0 %766 }
 0x190   :  { %v791_v47 = vadd.f32 %v769_v38, %v738_v42  ;;  %v790_v49 = vadd.f32 %v767_v39, %v737_v44 }
 0x193   :  { %v820_v45 = vpop.permute.xlu1 %819  ;;  %v822_v46 = vpop.permute.xlu0 %821 }
 0x194   :  { %v843_v50 = vadd.f32 %v820_v45, %v790_v49  ;;  %v844_v57 = vadd.f32 %v822_v46, %v791_v47  ;;  %v2067_v47 = vld [vmem:[%s3274_s0 + $0x2] ss:$0 sm:$0xff] }
 0x197   :  { %v873_v52 = vpop.permute.xlu1 %872  ;;  %v875_v53 = vpop.permute.xlu0 %874 }
 0x198   :  { %v896_v58 = vadd.f32 %v873_v52, %v843_v50  ;;  %v897_v60 = vadd.f32 %v875_v53, %v844_v57  ;;  %v2071_v57 = vld [vmem:[%s3274_s0 + $0x6] ss:$0 sm:$0xff] }
 0x199   :  { %v139_v52 = vmul.f32 %v2071_v57, %v2447_v8  ;;  %v192_v53 = vmul.f32 %v2071_v57, %v2455_v11 }
 0x19a   :  { %v910_v1 = vadd.f32 %v2661_v2, %v897_v60  ;;  %v909_v3 = vadd.f32 %v2661_v2, %v896_v58 }
 0x19b   :  { %v1161_v23 = vpop.permute.xlu1 %1160 }
 0x19c   :  { %v918_v7 = vmax.f32 %v910_v1, 0.0  ;;  %v917_v9 = vmax.f32 %v909_v3, 0.0 }
 0x19e   :  { %2148 = vmatprep.mubr.msk.f32.mxu0 %vm939_vm3, %v917_v9 }
 0x19f   :  { %2149 = vmatmul.mubr.msk.f32.vlgmr.msra.gmra.mxu0 %vm939_vm3, %v918_v7 }
 0x1a0   :  { %2183 = vmatpush3.msra.mxu0 %v2505_v27 }
 0x1a1   :  { %2184 = vmatprep.subr.mxu0 %v2345_v28 }
 0x1a2   :  { %2185 = vmatpush3.msra.mxu0 %v2511_v29 }
 0x1a3   :  { %2186 = vmatprep.subr.mxu0 %v2345_v28 }
 0x1a4   :  { %2187 = vmatpush3.msra.mxu0 %v2520_v30 }
 0x1a5   :  { %2188 = vmatprep.subr.mxu0 %v2345_v28 }
 0x1a6   :  { %2189 = vmatpush3.msra.mxu0 %v2527_v31 }
 0x1a7   :  { %2204 = vmatprep.subr.mxu0 %v2345_v28 }
 0x25f   :  { %v2150_v10 = vpop.f32.mrf.mxu0 }
 0x260   :  { %v2724_v58 = vadd.f32 %v2150_v10, %v2678_v12 }
 0x261   :  { %v1034_v15 = vpop.f32.mrf.mxu0 }
 0x262   :  { %v1035_v16 = vadd.f32 %v2678_v12, %v1034_v15 }
 0x264   :  { %v1154_v19 = vadd.f32 %v1151_v0, %v1035_v16 }
 0x266   :  { %v1155_v20 = vmul.f32 0.5, %v1154_v19  ;;  %v2733_v19 = vld [vmem:[%s3274_s0 + $0x3] ss:$0 sm:$0xff] }
 0x268   :  { %2260 = vtanh.f32 %v1155_v20  ;;  %v114_v20 = vmul.f32 %v2067_v47, %v2550_v33 }
 0x275   :  { %v2261_v21 = vpop.eup %2260 }
 0x276   :  { %v1157_v22 = vmul.f32 0.5, %v2261_v21  ;;  %v136_v21 = vmul.f32 %v2733_v19, %v2447_v8 }
 0x278   :  { %v1158_v24 = vadd.f32 0.5, %v1157_v22 }
 0x27a   :  { %v1163_v25 = vmul.f32 %v1161_v23, %v1158_v24  ;;  %v1170_v39 = vsub.f32 1.0, %v1158_v24 }
 0x27c   :  { %1165 = vrot.lane.b32.xlu0 %v1163_v25, %s2347_s23  ;;  %v189_v25 = vmul.f32 %v2733_v19, %v2455_v11 }
 0x280   :  { %1176 = vrot.lane.b32.xlu0 %v2533_v32, %s2348_s26 }
 0x2ee   :  { %v1166_v26 = vpop.permute.xlu0 %1165 }
 0x2ef   :  { %v1168_v37 = vadd.f32 %v1166_v26, %v1035_v16  ;;  %v2745_v26 = vld [vmem:[%s3274_s0 + $0x5] ss:$0 sm:$0xff] }
 0x2f1   :  { %2262 = vtanh.f32 %v1168_v37 }
 0x2f2   :  { %v1177_v0 = vpop.permute.xlu0 %1176 }
 0x2f3   :  { %v1179_v41 = vmul.f32 %v1177_v0, %v1158_v24 }
 0x2fe   :  { %v2263_v38 = vpop.eup %2262 }
 0x2ff   :  { %1172 = vrot.lane.b32.xlu1 %v2263_v38, %s2349_s27 }
 0x371   :  { %v1173_v40 = vpop.permute.xlu1 %1172 }
 0x372   :  { %v1175_v42 = vmul.f32 %v1173_v40, %v1170_v39  ;;  %v138_v40 = vmul.f32 %v2745_v26, %v2447_v8 }
 0x374   :  { %v2685_v44 = vadd.f32 %v1179_v41, %v1175_v42 }
 0x376   :  { %1182 = vrot.lane.b32.xlu1 %v2685_v44, %s2349_s27 }
 0x3e8   :  { %v1183_v45 = vpop.permute.xlu1 %1182 }
 0x3e9   :  { %2180 = vmatmul.mubr.msk.f32.vlgmr.msra.gmra.mxu1 %vm1080_vm1, %v1183_v45 }
 0x3ea   :  { %2194 = vmatpush3.msra.mxu1 %v2505_v27  ;;  %2201 = vmatprep.mubr.msk.f32.mxu1 %vm2346_vm0, %v2345_v28 }
 0x3eb   :  { %2195 = vmatprep.subr.mxu1 %v2345_v28 }
 0x3ec   :  { %2196 = vmatpush3.msra.mxu1 %v2511_v29  ;;  %v135_v29 = vmul.f32 %v2067_v47, %v2447_v8 }
 0x3ed   :  { %2197 = vmatprep.subr.mxu1 %v2345_v28 }
 0x3ee   :  { %2198 = vmatpush3.msra.mxu1 %v2520_v30  ;;  %v188_v30 = vmul.f32 %v2067_v47, %v2455_v11  ;;  %v191_v47 = vmul.f32 %v2745_v26, %v2455_v11 }
 0x3ef   :  { %2199 = vmatprep.subr.mxu1 %v2345_v28 }
 0x3f0   :  { %2200 = vmatpush3.msra.mxu1 %v2527_v31  ;;  %v2069_v31 = vld [vmem:[%s3274_s0 + $0x4] ss:$0 sm:$0xff] }
 0x3f1   :  { %2215 = vmatprep.subr.mxu1 %v2345_v28  ;;  %v137_v49 = vmul.f32 %v2069_v31, %v2447_v8  ;;  %v190_v50 = vmul.f32 %v2069_v31, %v2455_v11  ;;  %v116_v39 = vmul.f32 %v2069_v31, %v2550_v33 }
 0x4a9   :  { %v1252_v32 = vpop.f32.mrf.mxu1 }
 0x4aa   :  { %v1253_v27 = vadd.f32 %v2657_v59, %v1252_v32 }
 0x4ab   :  { %v2181_v46 = vpop.f32.mrf.mxu1 }
 0x4ac   :  { %1262 = vrot.lane.b32.xlu0 %v1253_v27, %s2347_s23  ;;  %v1256_v60 = vadd.f32 %v1253_v27, %v2724_v58 }
 0x4ae   :  { %v1257_v1 = vmul.f32 0.5, %v1256_v60 }
 0x4b0   :  { %153 = vrot.lane.b32.xlu0 %v135_v29, %s2343_s1  ;;  %2264 = vtanh.f32 %v1257_v1  ;;  %v2767_v29 = vld [vmem:[%s3274_s0 + $0x7] ss:$0 sm:$0xff] }
 0x4b4   :  { %206 = vrot.lane.b32.xlu0 %v188_v30, %s2344_s2 }
 0x4b8   :  { %157 = vrot.lane.b32.xlu0 %v137_v49, %s2343_s1 }
 0x4bc   :  { %210 = vrot.lane.b32.xlu0 %v190_v50, %s2344_s2 }
 0x4bd   :  { %v2265_v3 = vpop.eup %2264 }
 0x4be   :  { %v1259_v7 = vmul.f32 0.5, %v2265_v3  ;;  %v118_v3 = vmul.f32 %v2071_v57, %v2550_v33 }
 0x4c0   :  { %161 = vrot.lane.b32.xlu0 %v139_v52, %s2343_s1  ;;  %v2727_v9 = vadd.f32 0.5, %v1259_v7  ;;  %v140_v7 = vmul.f32 %v2767_v29, %v2447_v8 }
 0x4c4   :  { %214 = vrot.lane.b32.xlu0 %v192_v53, %s2344_s2 }
 0x51e   :  { %v1263_v15 = vpop.permute.xlu0 %1262 }
 0x51f   :  { %v1265_v16 = vmul.f32 %v1263_v15, %v2727_v9 }
 0x521   :  { %1267 = vrot.lane.b32.xlu1 %v1265_v16, %s2347_s23 }
 0x522   :  { %v154_v10 = vpop.permute.xlu0 %153 }
 0x523   :  { %v175_v22 = vadd.f32 %v154_v10, %v114_v20 }
 0x525   :  { %155 = vrot.lane.b32.xlu1 %v136_v21, %s2343_s1 }
 0x526   :  { %v207_v23 = vpop.permute.xlu0 %206 }
 0x527   :  { %v228_v24 = vadd.f32 %v207_v23, %v175_v22 }
 0x529   :  { %v241_v37 = vadd.f32 %v2552_v34, %v228_v24  ;;  %208 = vrot.lane.b32.xlu1 %v189_v25, %s2344_s2  ;;  %v193_v24 = vmul.f32 %v2767_v29, %v2455_v11 }
 0x52a   :  { %v158_v38 = vpop.permute.xlu0 %157 }
 0x52b   :  { %v249_v0 = vmax.f32 %v241_v37, 0.0  ;;  %v177_v41 = vadd.f32 %v158_v38, %v116_v39 }
 0x52d   :  { %159 = vrot.lane.b32.xlu1 %v138_v40, %s2343_s1  ;;  %v2754_v42 = vrot.slane %v249_v0, %v2564_v51  ;;  %v2757_v45 = vrot.slane %v249_v0, %v2569_v54  ;;  %v2760_v27 = vrot.slane %v249_v0, %v2582_v61  ;;  %v2774_v49 = vrot.slane %v249_v0, %v2595_v4 }
 0x52e   :  { %v211_v32 = vpop.permute.xlu0 %210 }
 0x52f   :  { %v230_v46 = vadd.f32 %v211_v32, %v177_v41  ;;  %v307_v30 = vmul.f32 %v2617_v18, %v2754_v42  ;;  %v360_v31 = vmul.f32 %v2615_v17, %v2757_v45  ;;  %v413_v60 = vmul.f32 %v2629_v36, %v2760_v27 }
 0x530   :  { %v466_v16 = vmul.f32 %v2627_v35, %v2774_v49  ;;  %v487_v11 = vmul.f32 %v2573_v56, %v2754_v42 }
 0x531   :  { %v243_v50 = vadd.f32 %v2552_v34, %v230_v46  ;;  %212 = vrot.lane.b32.xlu1 %v191_v47, %s2344_s2  ;;  %v368_v53 = vadd.f32 %v360_v31, %v307_v30 }
 0x532   :  { %v162_v52 = vpop.permute.xlu0 %161 }
 0x533   :  { %v251_v1 = vmax.f32 %v243_v50, 0.0  ;;  %v421_v15 = vadd.f32 %v413_v60, %v368_v53  ;;  %v179_v10 = vadd.f32 %v162_v52, %v118_v3  ;;  %v540_v50 = vmul.f32 %v2571_v55, %v2757_v45 }
 0x535   :  { %163 = vrot.lane.b32.xlu1 %v140_v7, %s2343_s1  ;;  %v2787_v20 = vrot.slane %v251_v1, %v2564_v51  ;;  %v2790_v21 = vrot.slane %v251_v1, %v2569_v54  ;;  %v2792_v23 = vadd.f32 %v466_v16, %v421_v15  ;;  %v2795_v57 = vrot.slane %v251_v1, %v2582_v61 }
 0x536   :  { %v215_v22 = vpop.permute.xlu0 %214  ;;  %v2804_v38 = vrot.slane %v251_v1, %v2595_v4 }
 0x537   :  { %v232_v8 = vadd.f32 %v215_v22, %v179_v10  ;;  %v309_v25 = vmul.f32 %v2617_v18, %v2787_v20  ;;  %v362_v37 = vmul.f32 %v2615_v17, %v2790_v21  ;;  %v415_v40 = vmul.f32 %v2629_v36, %v2795_v57 }
 0x538   :  { %v468_v46 = vmul.f32 %v2627_v35, %v2804_v38  ;;  %v489_v3 = vmul.f32 %v2573_v56, %v2787_v20 }
 0x539   :  { %v245_v0 = vadd.f32 %v2552_v34, %v232_v8  ;;  %216 = vrot.lane.b32.xlu1 %v193_v24, %s2344_s2  ;;  %v370_v39 = vadd.f32 %v362_v37, %v309_v25  ;;  %v115_v25 = vmul.f32 %v2733_v19, %v2550_v33 }
 0x53b   :  { %v253_v41 = vmax.f32 %v245_v0, 0.0  ;;  %v423_v32 = vadd.f32 %v415_v40, %v370_v39 }
 0x53d   :  { %505 = vrot.lane.b32.xlu1 %v487_v11, %s2343_s1  ;;  %v2816_v47 = vrot.slane %v253_v41, %v2564_v51  ;;  %v2819_v30 = vrot.slane %v253_v41, %v2569_v54  ;;  %v2821_v31 = vadd.f32 %v468_v46, %v423_v32  ;;  %v2826_v52 = vrot.slane %v253_v41, %v2582_v61 }
 0x53e   :  { %v2830_v53 = vrot.slane %v253_v41, %v2595_v4  ;;  %v117_v32 = vmul.f32 %v2745_v26, %v2550_v33 }
 0x53f   :  { %v311_v60 = vmul.f32 %v2617_v18, %v2816_v47  ;;  %v364_v1 = vmul.f32 %v2615_v17, %v2819_v30  ;;  %v417_v15 = vmul.f32 %v2629_v36, %v2826_v52 }
 0x540   :  { %v470_v10 = vmul.f32 %v2627_v35, %v2830_v53 }
 0x541   :  { %558 = vrot.lane.b32.xlu1 %v540_v50, %s2343_s1  ;;  %v372_v7 = vadd.f32 %v364_v1, %v311_v60 }
 0x543   :  { %v425_v16 = vadd.f32 %v417_v15, %v372_v7 }
 0x545   :  { %509 = vrot.lane.b32.xlu1 %v489_v3, %s2343_s1  ;;  %v2843_v22 = vadd.f32 %v470_v10, %v425_v16 }
 0x593   :  { %v2845_v8 = vpop.permute.xlu1 %1267 }
 0x597   :  { %v156_v24 = vpop.permute.xlu1 %155 }
 0x598   :  { %v176_v37 = vadd.f32 %v156_v24, %v115_v25  ;;  %v119_v25 = vmul.f32 %v2767_v29, %v2550_v33 }
 0x59b   :  { %v209_v0 = vpop.permute.xlu1 %208 }
 0x59c   :  { %v229_v39 = vadd.f32 %v209_v0, %v176_v37 }
 0x59e   :  { %v242_v40 = vadd.f32 %v2552_v34, %v229_v39 }
 0x59f   :  { %v160_v41 = vpop.permute.xlu1 %159 }
 0x5a0   :  { %v250_v11 = vmax.f32 %v242_v40, 0.0  ;;  %v178_v46 = vadd.f32 %v160_v41, %v117_v32 }
 0x5a2   :  { %v2853_v50 = vrot.slane %v250_v11, %v2564_v51  ;;  %v2856_v60 = vrot.slane %v250_v11, %v2569_v54  ;;  %v2861_v7 = vrot.slane %v250_v11, %v2582_v61  ;;  %v2874_v0 = vrot.slane %v250_v11, %v2595_v4 }
 0x5a3   :  { %v213_v1 = vpop.permute.xlu1 %212  ;;  %v593_v11 = vmul.f32 %v2586_v63, %v2760_v27 }
 0x5a4   :  { %v231_v3 = vadd.f32 %v213_v1, %v178_v46  ;;  %v488_v19 = vmul.f32 %v2573_v56, %v2853_v50  ;;  %v361_v26 = vmul.f32 %v2615_v17, %v2856_v60  ;;  %v308_v10 = vmul.f32 %v2617_v18, %v2853_v50 }
 0x5a5   :  { %v541_v37 = vmul.f32 %v2571_v55, %v2856_v60  ;;  %v414_v39 = vmul.f32 %v2629_v36, %v2861_v7 }
 0x5a6   :  { %v244_v15 = vadd.f32 %v2552_v34, %v231_v3  ;;  %507 = vrot.lane.b32.xlu0 %v488_v19, %s2343_s1  ;;  %v369_v40 = vadd.f32 %v361_v26, %v308_v10  ;;  %v467_v19 = vmul.f32 %v2627_v35, %v2874_v0 }
 0x5a7   :  { %v164_v16 = vpop.permute.xlu1 %163 }
 0x5a8   :  { %v252_v24 = vmax.f32 %v244_v15, 0.0  ;;  %v180_v41 = vadd.f32 %v164_v16, %v119_v25  ;;  %v422_v33 = vadd.f32 %v414_v39, %v369_v40  ;;  %v594_v40 = vmul.f32 %v2586_v63, %v2861_v7 }
 0x5aa   :  { %560 = vrot.lane.b32.xlu0 %v541_v37, %s2343_s1  ;;  %v2880_v32 = vrot.slane %v252_v24, %v2564_v51  ;;  %v2883_v1 = vrot.slane %v252_v24, %v2569_v54  ;;  %v2892_v15 = vrot.slane %v252_v24, %v2582_v61  ;;  %v2897_v16 = vadd.f32 %v467_v19, %v422_v33 }
 0x5ab   :  { %v217_v46 = vpop.permute.xlu1 %216 }
 0x5ac   :  { %v233_v29 = vadd.f32 %v217_v46, %v180_v41  ;;  %v490_v3 = vmul.f32 %v2573_v56, %v2880_v32  ;;  %v310_v25 = vmul.f32 %v2617_v18, %v2880_v32  ;;  %v363_v37 = vmul.f32 %v2615_v17, %v2883_v1 }
 0x5ad   :  { %v2910_v41 = vrot.slane %v252_v24, %v2595_v4  ;;  %v416_v33 = vmul.f32 %v2629_v36, %v2892_v15  ;;  %v646_v24 = vmul.f32 %v2584_v62, %v2774_v49 }
 0x5ae   :  { %v246_v26 = vadd.f32 %v2552_v34, %v233_v29  ;;  %611 = vrot.lane.b32.xlu0 %v593_v11, %s2343_s1  ;;  %511 = vrot.lane.b32.xlu1 %v490_v3, %s2343_s1  ;;  %v542_v34 = vmul.f32 %v2571_v55, %v2790_v21  ;;  %v371_v46 = vadd.f32 %v363_v37, %v310_v25 }
 0x5af   :  { %v2899_v10 = vpop.permute.xlu1 %505  ;;  %v469_v25 = vmul.f32 %v2627_v35, %v2910_v41 }
 0x5b0   :  { %v254_v39 = vmax.f32 %v246_v26, 0.0  ;;  %v424_v19 = vadd.f32 %v416_v33, %v371_v46  ;;  %v543_v26 = vmul.f32 %v2571_v55, %v2883_v1 }
 0x5b2   :  { %613 = vrot.lane.b32.xlu0 %v594_v40, %s2343_s1  ;;  %562 = vrot.lane.b32.xlu1 %v542_v34, %s2343_s1  ;;  %v2917_v29 = vrot.slane %v254_v39, %v2569_v54  ;;  %v2922_v3 = vrot.slane %v254_v39, %v2564_v51  ;;  %v2931_v37 = vrot.slane %v254_v39, %v2582_v61 }
 0x5b3   :  { %v2919_v11 = vpop.permute.xlu1 %558  ;;  %v2935_v54 = vadd.f32 %v469_v25, %v424_v19  ;;  %v2940_v34 = vrot.slane %v254_v39, %v2595_v4  ;;  %v647_v61 = vmul.f32 %v2584_v62, %v2874_v0  ;;  %v491_v19 = vmul.f32 %v2573_v56, %v2816_v47 }
 0x5b4   :  { %v365_v51 = vmul.f32 %v2615_v17, %v2917_v29  ;;  %v312_v46 = vmul.f32 %v2617_v18, %v2922_v3  ;;  %v699_v39 = vmul.f32 %v2599_v6, %v2754_v42  ;;  %v596_v25 = vmul.f32 %v2586_v63, %v2892_v15 }
 0x5b5   :  { %v471_v4 = vmul.f32 %v2627_v35, %v2940_v34  ;;  %v492_v35 = vmul.f32 %v2573_v56, %v2922_v3  ;;  %v544_v42 = vmul.f32 %v2571_v55, %v2819_v30  ;;  %v648_v56 = vmul.f32 %v2584_v62, %v2804_v38 }
 0x5b6   :  { %664 = vrot.lane.b32.xlu0 %v646_v24, %s2343_s1  ;;  %564 = vrot.lane.b32.xlu1 %v543_v26, %s2343_s1  ;;  %v418_v24 = vmul.f32 %v2629_v36, %v2931_v37  ;;  %v373_v17 = vadd.f32 %v365_v51, %v312_v46  ;;  %v1270_v36 = vadd.f32 %v2845_v8, %v2724_v58 }
 0x5b7   :  { %v510_v40 = vpop.permute.xlu1 %509  ;;  %v700_v51 = vmul.f32 %v2599_v6, %v2853_v50  ;;  %v752_v58 = vmul.f32 %v2597_v5, %v2757_v45  ;;  %v649_v8 = vmul.f32 %v2584_v62, %v2910_v41  ;;  %v545_v50 = vmul.f32 %v2571_v55, %v2917_v29 }
 0x5b8   :  { %v2945_v33 = vadd.f32 %v510_v40, %v2821_v31  ;;  %v426_v18 = vadd.f32 %v418_v24, %v373_v17  ;;  %v595_v31 = vmul.f32 %v2586_v63, %v2795_v57  ;;  %2266 = vtanh.f32 %v1270_v36 }
 0x5b9   :  { %v597_v45 = vmul.f32 %v2586_v63, %v2826_v52  ;;  %v805_v46 = vmul.f32 %v2609_v14, %v2760_v27  ;;  %v702_v55 = vmul.f32 %v2599_v6, %v2880_v32  ;;  %v650_v27 = vmul.f32 %v2584_v62, %v2830_v53 }
 0x5ba   :  { %666 = vrot.lane.b32.xlu0 %v647_v61, %s2343_s1  ;;  %513 = vrot.lane.b32.xlu1 %v491_v19, %s2343_s1  ;;  %v2961_v26 = vadd.f32 %v471_v4, %v426_v18  ;;  %v753_v61 = vmul.f32 %v2597_v5, %v2856_v60  ;;  %v701_v19 = vmul.f32 %v2599_v6, %v2787_v20 }
 0x5bb   :  { %v598_v60 = vmul.f32 %v2586_v63, %v2931_v37  ;;  %v858_v32 = vmul.f32 %v2607_v13, %v2774_v49  ;;  %v806_v20 = vmul.f32 %v2609_v14, %v2861_v7  ;;  %v755_v24 = vmul.f32 %v2597_v5, %v2883_v1 }
 0x5bc   :  { %v754_v63 = vmul.f32 %v2597_v5, %v2790_v21  ;;  %v703_v49 = vmul.f32 %v2599_v6, %v2816_v47  ;;  %v651_v7 = vmul.f32 %v2584_v62, %v2940_v34  ;;  %v704_v1 = vmul.f32 %v2599_v6, %v2922_v3 }
 0x5bd   :  { %v859_v21 = vmul.f32 %v2607_v13, %v2874_v0  ;;  %v756_v47 = vmul.f32 %v2597_v5, %v2819_v30  ;;  %v807_v62 = vmul.f32 %v2609_v14, %v2795_v57  ;;  %v757_v6 = vmul.f32 %v2597_v5, %v2917_v29 }
 0x5be   :  { %615 = vrot.lane.b32.xlu0 %v595_v31, %s2343_s1  ;;  %717 = vrot.lane.b32.xlu1 %v699_v39, %s2344_s2  ;;  %v808_v0 = vmul.f32 %v2609_v14, %v2892_v15  ;;  %v809_v30 = vmul.f32 %v2609_v14, %v2826_v52  ;;  %v860_v57 = vmul.f32 %v2607_v13, %v2804_v38 }
 0x5bf   :  { %v862_v5 = vmul.f32 %v2607_v13, %v2830_v53  ;;  %v861_v15 = vmul.f32 %v2607_v13, %v2910_v41  ;;  %v810_v52 = vmul.f32 %v2609_v14, %v2931_v37  ;;  %v863_v38 = vmul.f32 %v2607_v13, %v2940_v34 }
 0x5c2   :  { %617 = vrot.lane.b32.xlu1 %v596_v25, %s2343_s1  ;;  %515 = vrot.lane.b32.xlu0 %v492_v35, %s2343_s1 }
 0x5c5   :  { %v2267_v40 = vpop.eup %2266 }
 0x5c6   :  { %566 = vrot.lane.b32.xlu1 %v544_v42, %s2343_s1  ;;  %719 = vrot.lane.b32.xlu0 %v700_v51, %s2344_s2 }
 0x5ca   :  { %770 = vrot.lane.b32.xlu1 %v752_v58, %s2344_s2  ;;  %668 = vrot.lane.b32.xlu0 %v648_v56, %s2343_s1 }
 0x5ce   :  { %670 = vrot.lane.b32.xlu1 %v649_v8, %s2343_s1  ;;  %568 = vrot.lane.b32.xlu0 %v545_v50, %s2343_s1 }
 0x5d2   :  { %619 = vrot.lane.b32.xlu1 %v597_v45, %s2343_s1  ;;  %1274 = vrot.lane.b32.xlu0 %v2267_v40, %s2349_s27  ;;  %v1278_v40 = vmul.f32 %v2727_v9, %v2685_v44 }
 0x5d6   :  { %823 = vrot.lane.b32.xlu1 %v805_v46, %s2344_s2  ;;  %772 = vrot.lane.b32.xlu0 %v753_v61, %s2344_s2  ;;  %v527_v61 = vadd.f32 %v2899_v10, %v2792_v23 }
 0x5da   :  { %723 = vrot.lane.b32.xlu1 %v702_v55, %s2344_s2  ;;  %721 = vrot.lane.b32.xlu0 %v701_v19, %s2344_s2 }
 0x5de   :  { %672 = vrot.lane.b32.xlu1 %v650_v27, %s2343_s1  ;;  %621 = vrot.lane.b32.xlu0 %v598_v60, %s2343_s1  ;;  %v580_v60 = vadd.f32 %v2919_v11, %v527_v61 }
 0x5e2   :  { %876 = vrot.lane.b32.xlu1 %v858_v32, %s2344_s2  ;;  %825 = vrot.lane.b32.xlu0 %v806_v20, %s2344_s2 }
 0x5e6   :  { %776 = vrot.lane.b32.xlu1 %v755_v24, %s2344_s2  ;;  %774 = vrot.lane.b32.xlu0 %v754_v63, %s2344_s2 }
 0x5ea   :  { %725 = vrot.lane.b32.xlu1 %v703_v49, %s2344_s2  ;;  %674 = vrot.lane.b32.xlu0 %v651_v7, %s2343_s1 }
 0x5ee   :  { %727 = vrot.lane.b32.xlu1 %v704_v1, %s2344_s2  ;;  %878 = vrot.lane.b32.xlu0 %v859_v21, %s2344_s2 }
 0x5f2   :  { %778 = vrot.lane.b32.xlu1 %v756_v47, %s2344_s2  ;;  %827 = vrot.lane.b32.xlu0 %v807_v62, %s2344_s2 }
 0x5f6   :  { %780 = vrot.lane.b32.xlu1 %v757_v6, %s2344_s2  ;;  %829 = vrot.lane.b32.xlu0 %v808_v0, %s2344_s2 }
 0x5fa   :  { %831 = vrot.lane.b32.xlu1 %v809_v30, %s2344_s2  ;;  %880 = vrot.lane.b32.xlu0 %v860_v57, %s2344_s2 }
 0x5fe   :  { %884 = vrot.lane.b32.xlu1 %v862_v5, %s2344_s2  ;;  %882 = vrot.lane.b32.xlu0 %v861_v15, %s2344_s2 }
 0x602   :  { %833 = vrot.lane.b32.xlu0 %v810_v52, %s2344_s2 }
 0x606   :  { %886 = vrot.lane.b32.xlu0 %v863_v38, %s2344_s2 }
 0x618   :  { %v508_v29 = vpop.permute.xlu0 %507 }
 0x619   :  { %v528_v21 = vadd.f32 %v508_v29, %v2897_v16 }
 0x61c   :  { %v561_v3 = vpop.permute.xlu0 %560 }
 0x61d   :  { %v581_v62 = vadd.f32 %v561_v3, %v528_v21 }
 0x620   :  { %v612_v53 = vpop.permute.xlu0 %611  ;;  %v512_v17 = vpop.permute.xlu1 %511 }
 0x621   :  { %v3068_v41 = vadd.f32 %v512_v17, %v2935_v54  ;;  %v1272_v54 = vsub.f32 1.0, %v2727_v9  ;;  %v633_v32 = vadd.f32 %v612_v53, %v580_v60 }
 0x624   :  { %v614_v4 = vpop.permute.xlu0 %613  ;;  %v563_v18 = vpop.permute.xlu1 %562 }
 0x625   :  { %v634_v0 = vadd.f32 %v614_v4, %v581_v62 }
 0x628   :  { %v665_v31 = vpop.permute.xlu0 %664  ;;  %v565_v39 = vpop.permute.xlu1 %564 }
 0x629   :  { %v686_v63 = vadd.f32 %v665_v31, %v633_v32 }
 0x62c   :  { %v667_v36 = vpop.permute.xlu0 %666  ;;  %v514_v14 = vpop.permute.xlu1 %513 }
 0x62d   :  { %v687_v5 = vadd.f32 %v667_v36, %v634_v0  ;;  %v531_v4 = vadd.f32 %v514_v14, %v2843_v22 }
 0x630   :  { %v616_v37 = vpop.permute.xlu0 %615  ;;  %v718_v25 = vpop.permute.xlu1 %717 }
 0x631   :  { %v739_v49 = vadd.f32 %v718_v25, %v686_v63  ;;  %v582_v25 = vadd.f32 %v563_v18, %v2945_v33 }
 0x634   :  { %v3070_v35 = vpop.permute.xlu0 %515  ;;  %v618_v13 = vpop.permute.xlu1 %617 }
 0x635   :  { %v532_v14 = vadd.f32 %v3070_v35, %v2961_v26 }
 0x638   :  { %v720_v34 = vpop.permute.xlu0 %719  ;;  %v567_v42 = vpop.permute.xlu1 %566 }
 0x639   :  { %v740_v52 = vadd.f32 %v720_v34, %v687_v5  ;;  %v583_v34 = vadd.f32 %v565_v39, %v3068_v41 }
 0x63c   :  { %v669_v51 = vpop.permute.xlu0 %668  ;;  %v771_v58 = vpop.permute.xlu1 %770 }
 0x63d   :  { %v792_v1 = vadd.f32 %v771_v58, %v739_v49  ;;  %v635_v58 = vadd.f32 %v616_v37, %v582_v25 }
 0x640   :  { %v3072_v56 = vpop.permute.xlu0 %568  ;;  %v671_v8 = vpop.permute.xlu1 %670 }
 0x644   :  { %v1275_v50 = vpop.permute.xlu0 %1274  ;;  %v620_v45 = vpop.permute.xlu1 %619 }
 0x645   :  { %v1277_v46 = vmul.f32 %v1275_v50, %v1272_v54 }
 0x647   :  { %v3079_v55 = vadd.f32 %v1278_v40, %v1277_v46  ;;  %v584_v40 = vadd.f32 %v567_v42, %v531_v4  ;;  %v688_v46 = vadd.f32 %v669_v51, %v635_v58  ;;  %v585_v42 = vadd.f32 %v3072_v56, %v532_v14 }
 0x648   :  { %v773_v19 = vpop.permute.xlu0 %772  ;;  %v824_v27 = vpop.permute.xlu1 %823 }
 0x649   :  { %1281 = vrot.lane.b32.xlu1 %v3079_v55, %s2349_s27  ;;  %v845_v23 = vadd.f32 %v824_v27, %v792_v1  ;;  %v793_v17 = vadd.f32 %v773_v19, %v740_v52  ;;  %v636_v27 = vadd.f32 %v618_v13, %v583_v34  ;;  %v637_v19 = vadd.f32 %v620_v45, %v584_v40 }
 0x64b   :  { %v689_v18 = vadd.f32 %v671_v8, %v636_v27 }
 0x64c   :  { %v722_v20 = vpop.permute.xlu0 %721  ;;  %v724_v24 = vpop.permute.xlu1 %723 }
 0x64d   :  { %v741_v60 = vadd.f32 %v722_v20, %v688_v46  ;;  %v742_v37 = vadd.f32 %v724_v24, %v689_v18 }
 0x650   :  { %v622_v7 = vpop.permute.xlu0 %621  ;;  %v673_v9 = vpop.permute.xlu1 %672 }
 0x651   :  { %v690_v63 = vadd.f32 %v673_v9, %v637_v19  ;;  %v638_v20 = vadd.f32 %v622_v7, %v585_v42  ;;  %v3168_v42 = vld [vmem:[%s3283_s9] ss:$0 sm:$0xff] }
 0x654   :  { %v826_v10 = vpop.permute.xlu0 %825  ;;  %v877_v47 = vpop.permute.xlu1 %876 }
 0x655   :  { %v898_v6 = vadd.f32 %v877_v47, %v845_v23  ;;  %v846_v31 = vadd.f32 %v826_v10, %v793_v17  ;;  %v3109_v17 = vld [vmem:[%s3281_s7 + $0x18] sm:$0xff] }
 0x657   :  { %v911_v11 = vadd.f32 %v2661_v2, %v898_v6 }
 0x658   :  { %v775_v30 = vpop.permute.xlu0 %774  ;;  %v777_v57 = vpop.permute.xlu1 %776 }
 0x659   :  { %v919_v15 = vmax.f32 %v911_v11, 0.0  ;;  %v794_v22 = vadd.f32 %v775_v30, %v741_v60  ;;  %v795_v13 = vadd.f32 %v777_v57, %v742_v37 }
 0x65b   :  { %2151 = vmatprep.mubr.msk.f32.mxu0 %vm939_vm3, %v919_v15 }
 0x65c   :  { %v675_v38 = vpop.permute.xlu0 %674  ;;  %v726_v53 = vpop.permute.xlu1 %725 }
 0x65d   :  { %v743_v49 = vadd.f32 %v726_v53, %v690_v63  ;;  %v691_v47 = vadd.f32 %v675_v38, %v638_v20 }
 0x660   :  { %v879_v16 = vpop.permute.xlu0 %878  ;;  %v728_v29 = vpop.permute.xlu1 %727 }
 0x661   :  { %v899_v3 = vadd.f32 %v879_v16, %v846_v31  ;;  %v744_v24 = vadd.f32 %v728_v29, %v691_v47  ;;  %v3125_v31 = vld [vmem:[%s3281_s7 + $0x8] sm:$0xff]  ;;  %v3132_v16 = vld [vmem:[%s3281_s7] sm:$0xff] }
 0x663   :  { %v912_v54 = vadd.f32 %v2661_v2, %v899_v3 }
 0x664   :  { %v828_v50 = vpop.permute.xlu0 %827  ;;  %v779_v36 = vpop.permute.xlu1 %778 }
 0x665   :  { %v920_v61 = vmax.f32 %v912_v54, 0.0  ;;  %v847_v1 = vadd.f32 %v828_v50, %v794_v22  ;;  %v796_v51 = vadd.f32 %v779_v36, %v743_v49 }
 0x667   :  { %2152 = vmatmul.mubr.msk.f32.gmra.mxu0 %vm939_vm3, %v920_v61 }
 0x668   :  { %v830_v32 = vpop.permute.xlu0 %829  ;;  %v781_v33 = vpop.permute.xlu1 %780 }
 0x669   :  { %v848_v21 = vadd.f32 %v830_v32, %v795_v13  ;;  %v797_v11 = vadd.f32 %v781_v33, %v744_v24 }
 0x66c   :  { %v881_v41 = vpop.permute.xlu0 %880  ;;  %v832_v39 = vpop.permute.xlu1 %831 }
 0x66d   :  { %v900_v45 = vadd.f32 %v881_v41, %v847_v1  ;;  %v849_v8 = vadd.f32 %v832_v39, %v796_v51 }
 0x66f   :  { %v913_v23 = vadd.f32 %v2661_v2, %v900_v45 }
 0x670   :  { %v883_v9 = vpop.permute.xlu0 %882  ;;  %v885_v10 = vpop.permute.xlu1 %884 }
 0x671   :  { %v921_v62 = vmax.f32 %v913_v23, 0.0  ;;  %v901_v26 = vadd.f32 %v883_v9, %v848_v21  ;;  %v902_v35 = vadd.f32 %v885_v10, %v849_v8 }
 0x673   :  { %v914_v6 = vadd.f32 %v2661_v2, %v901_v26  ;;  %v915_v0 = vadd.f32 %v2661_v2, %v902_v35  ;;  %2154 = vmatprep.mubr.msk.f32.mxu0 %vm939_vm3, %v921_v62 }
 0x674   :  { %v834_v56 = vpop.permute.xlu0 %833 }
 0x675   :  { %v922_v7 = vmax.f32 %v914_v6, 0.0  ;;  %v923_v30 = vmax.f32 %v915_v0, 0.0  ;;  %v850_v57 = vadd.f32 %v834_v56, %v797_v11 }
 0x677   :  { %2155 = vmatmul.mubr.msk.f32.gmra.mxu0 %vm939_vm3, %v922_v7 }
 0x678   :  { %v887_v5 = vpop.permute.xlu0 %886  ;;  %2157 = vmatprep.mubr.msk.f32.mxu0 %vm939_vm3, %v923_v30 }
 0x679   :  { %v903_v15 = vadd.f32 %v887_v5, %v850_v57 }
 0x67b   :  { %v916_v52 = vadd.f32 %v2661_v2, %v903_v15  ;;  %v3118_v2 = vld [vmem:[%s3281_s7 + $0x10] sm:$0xff] }
 0x67d   :  { %v924_v38 = vmax.f32 %v916_v52, 0.0 }
 0x67f   :  { %2158 = vmatmul.mubr.msk.f32.gmra.mxu0 %vm939_vm3, %v924_v38 }
 0x680   :  { %2190 = vmatprep.mubr.msk.f32.mxu0 %vm2346_vm0, %v2345_v28 }
 0x6bb   :  { %v1282_v53 = vpop.permute.xlu1 %1281 }
 0x6bc   :  { %2191 = vmatmul.mubr.msk.f32.vlgmr.msra.gmra.mxu0 %vm1080_vm1, %v1282_v53 }
 0x6bd   :  { %2205 = vmatpush3.msra.mxu0 %v3109_v17  ;;  %2212 = vmatprep.mubr.msk.f32.mxu0 %vm2346_vm0, %v2345_v28 }
 0x6be   :  { %2206 = vmatprep.subr.mxu0 %v2345_v28 }
 0x6bf   :  { %2207 = vmatpush3.msra.mxu0 %v3118_v2 }
 0x6c0   :  { %2208 = vmatprep.subr.mxu0 %v2345_v28 }
 0x6c1   :  { %2209 = vmatpush3.msra.mxu0 %v3125_v31 }
 0x6c2   :  { %2210 = vmatprep.subr.mxu0 %v2345_v28 }
 0x6c3   :  { %2211 = vmatpush3.msra.mxu0 %v3132_v16 }
 0x6c4   :  { %2226 = vmatprep.subr.mxu0 %v2345_v28 }
 0x727   :  { %v2153_v29 = vpop.f32.mrf.mxu0 }
 0x728   :  { %v1050_v45 = vadd.f32 %v2153_v29, %v2678_v12 }
 0x729   :  { %v1044_v25 = vpop.f32.mrf.mxu0 }
 0x72a   :  { %v1045_v40 = vadd.f32 %v2678_v12, %v1044_v25 }
 0x737   :  { %v3136_v3 = vpop.f32.mrf.mxu0 }
 0x739   :  { %v3138_v4 = vpop.f32.mrf.mxu0 }
 0x73a   :  { %v1055_v15 = vadd.f32 %v2678_v12, %v3138_v4 }
 0x73f   :  { %v3140_v58 = vpop.f32.mrf.mxu0 }
 0x741   :  { %v3142_v54 = vpop.f32.mrf.mxu0 }
 0x77c   :  { %v1351_v50 = vpop.f32.mrf.mxu0 }
 0x77d   :  { %v1352_v36 = vadd.f32 %v2657_v59, %v1351_v50 }
 0x77e   :  { %v2192_v34 = vpop.f32.mrf.mxu0 }
 0x77f   :  { %1361 = vrot.lane.b32.xlu0 %v1352_v36, %s2347_s23  ;;  %v1355_v46 = vadd.f32 %v1352_v36, %v1045_v40 }
 0x781   :  { %v1356_v61 = vmul.f32 0.5, %v1355_v46 }
 0x783   :  { %2268 = vtanh.f32 %v1356_v61 }
 0x790   :  { %v2269_v27 = vpop.eup %2268 }
 0x791   :  { %v1358_v19 = vmul.f32 0.5, %v2269_v27 }
 0x793   :  { %v1359_v60 = vadd.f32 0.5, %v1358_v19 }
 0x795   :  { %v1371_v59 = vsub.f32 1.0, %v1359_v60  ;;  %v1377_v37 = vmul.f32 %v1359_v60, %v3079_v55 }
 0x7f1   :  { %v1362_v32 = vpop.permute.xlu0 %1361 }
 0x7f2   :  { %v1364_v33 = vmul.f32 %v1362_v32, %v1359_v60 }
 0x7f4   :  { %1366 = vrot.lane.b32.xlu1 %v1364_v33, %s2347_s23 }
 0x866   :  { %v1367_v18 = vpop.permute.xlu1 %1366 }
 0x867   :  { %v1369_v63 = vadd.f32 %v1367_v18, %v1045_v40 }
 0x869   :  { %2270 = vtanh.f32 %v1369_v63 }
 0x876   :  { %v2271_v22 = vpop.eup %2270 }
 0x877   :  { %1373 = vrot.lane.b32.xlu0 %v2271_v22, %s2349_s27 }
 0x8e9   :  { %v1374_v14 = vpop.permute.xlu0 %1373 }
 0x8ea   :  { %v1376_v49 = vmul.f32 %v1374_v14, %v1371_v59 }
 0x8ec   :  { %v3150_v1 = vadd.f32 %v1377_v37, %v1376_v49 }
 0x8ee   :  { %1380 = vrot.lane.b32.xlu1 %v3150_v1, %s2349_s27 }
 0x960   :  { %v1381_v41 = vpop.permute.xlu1 %1380 }
 0x961   :  { %2202 = vmatmul.mubr.msk.f32.vlgmr.msra.gmra.mxu1 %vm1080_vm1, %v1381_v41 }
 0x962   :  { %2216 = vmatpush3.msra.mxu1 %v3109_v17  ;;  %2223 = vmatprep.mubr.msk.f32.mxu1 %vm2346_vm0, %v2345_v28 }
 0x963   :  { %2217 = vmatprep.subr.mxu1 %v2345_v28 }
 0x964   :  { %2218 = vmatpush3.msra.mxu1 %v3118_v2 }
 0x965   :  { %2219 = vmatprep.subr.mxu1 %v2345_v28 }
 0x966   :  { %2220 = vmatpush3.msra.mxu1 %v3125_v31 }
 0x967   :  { %2221 = vmatprep.subr.mxu1 %v2345_v28 }
 0x968   :  { %2222 = vmatpush3.msra.mxu1 %v3132_v16 }
 0x969   :  { %2237 = vmatprep.subr.mxu1 %v2345_v28 }
 0xa21   :  { %v1450_v39 = vpop.f32.mrf.mxu1 }
 0xa22   :  { %v1451_v13 = vadd.f32 %v3168_v42, %v1450_v39 }
 0xa23   :  { %v2203_v51 = vpop.f32.mrf.mxu1 }
 0xa24   :  { %1460 = vrot.lane.b32.xlu0 %v1451_v13, %s2347_s23  ;;  %v1454_v20 = vadd.f32 %v1451_v13, %v1050_v45 }
 0xa26   :  { %v1455_v21 = vmul.f32 0.5, %v1454_v20 }
 0xa28   :  { %2272 = vtanh.f32 %v1455_v21 }
 0xa35   :  { %v2273_v23 = vpop.eup %2272 }
 0xa36   :  { %v1457_v8 = vmul.f32 0.5, %v2273_v23 }
 0xa38   :  { %v1458_v9 = vadd.f32 0.5, %v1457_v8 }
 0xa3a   :  { %v1470_v24 = vsub.f32 1.0, %v1458_v9  ;;  %v1476_v0 = vmul.f32 %v1458_v9, %v3150_v1 }
 0xa96   :  { %v1461_v10 = vpop.permute.xlu0 %1460 }
 0xa97   :  { %v1463_v47 = vmul.f32 %v1461_v10, %v1458_v9 }
 0xa99   :  { %1465 = vrot.lane.b32.xlu1 %v1463_v47, %s2347_s23 }
 0xb0b   :  { %v1466_v62 = vpop.permute.xlu1 %1465 }
 0xb0c   :  { %v1468_v26 = vadd.f32 %v1466_v62, %v1050_v45 }
 0xb0e   :  { %2274 = vtanh.f32 %v1468_v26 }
 0xb1b   :  { %v2275_v35 = vpop.eup %2274 }
 0xb1c   :  { %1472 = vrot.lane.b32.xlu0 %v2275_v35, %s2349_s27 }
 0xb8e   :  { %v1473_v6 = vpop.permute.xlu0 %1472 }
 0xb8f   :  { %v1475_v56 = vmul.f32 %v1473_v6, %v1470_v24 }
 0xb91   :  { %v3176_v11 = vadd.f32 %v1476_v0, %v1475_v56 }
 0xb93   :  { %1479 = vrot.lane.b32.xlu1 %v3176_v11, %s2349_s27 }
 0xc05   :  { %v1480_v7 = vpop.permute.xlu1 %1479 }
 0xc06   :  { %2213 = vmatmul.mubr.msk.f32.vlgmr.msra.gmra.mxu0 %vm1080_vm1, %v1480_v7 }
 0xc07   :  { %2227 = vmatpush3.msra.mxu0 %v3109_v17  ;;  %2234 = vmatprep.mubr.msk.f32.mxu0 %vm2346_vm0, %v2345_v28 }
 0xc08   :  { %2228 = vmatprep.subr.mxu0 %v2345_v28 }
 0xc09   :  { %2229 = vmatpush3.msra.mxu0 %v3118_v2 }
 0xc0a   :  { %2230 = vmatprep.subr.mxu0 %v2345_v28 }
 0xc0b   :  { %2231 = vmatpush3.msra.mxu0 %v3125_v31 }
 0xc0c   :  { %2232 = vmatprep.subr.mxu0 %v2345_v28 }
 0xc0d   :  { %2233 = vmatpush3.msra.mxu0 %v3132_v16 }
 0xcc6   :  { %v1549_v30 = vpop.f32.mrf.mxu0 }
 0xcc7   :  { %v1550_v57 = vadd.f32 %v3168_v42, %v1549_v30 }
 0xcc8   :  { %v2214_v5 = vpop.f32.mrf.mxu0 }
 0xcc9   :  { %1559 = vrot.lane.b32.xlu0 %v1550_v57, %s2347_s23  ;;  %v1553_v52 = vadd.f32 %v1550_v57, %v1055_v15 }
 0xccb   :  { %v1554_v38 = vmul.f32 0.5, %v1553_v52 }
 0xccd   :  { %2276 = vtanh.f32 %v1554_v38 }
 0xcda   :  { %v2277_v53 = vpop.eup %2276 }
 0xcdb   :  { %v1556_v29 = vmul.f32 0.5, %v2277_v53 }
 0xcdd   :  { %v1557_v25 = vadd.f32 0.5, %v1556_v29 }
 0xcdf   :  { %v1569_v61 = vsub.f32 1.0, %v1557_v25  ;;  %v1575_v12 = vmul.f32 %v1557_v25, %v3176_v11 }
 0xd3b   :  { %v1560_v50 = vpop.permute.xlu0 %1559 }
 0xd3c   :  { %v1562_v36 = vmul.f32 %v1560_v50, %v1557_v25  ;;  %v2092_v25 = vld [vmem:[%s3284_s10] ss:$0 sm:$0xff]  ;;  %s2350_s10 = smov [#allocation5]  }
 0xd3e   :  { %1564 = vrot.lane.b32.xlu1 %v1562_v36, %s2347_s23 }
 0xdb0   :  { %v1565_v34 = vpop.permute.xlu1 %1564 }
 0xdb1   :  { %v1567_v40 = vadd.f32 %v1565_v34, %v1055_v15 }
 0xdb3   :  { %2278 = vtanh.f32 %v1567_v40 }
 0xdc0   :  { %v2279_v46 = vpop.eup %2278 }
 0xdc1   :  { %1571 = vrot.lane.b32.xlu0 %v2279_v46, %s2349_s27 }
 0xe33   :  { %v1572_v27 = vpop.permute.xlu0 %1571 }
 0xe34   :  { %v1574_v4 = vmul.f32 %v1572_v27, %v1569_v61 }
 0xe36   :  { %v3197_v19 = vadd.f32 %v1575_v12, %v1574_v4 }
 0xe38   :  { %1578 = vrot.lane.b32.xlu1 %v3197_v19, %s2349_s27 }
 0xeaa   :  { %v1579_v60 = vpop.permute.xlu1 %1578 }
 0xeab   :  { %2224 = vmatmul.mubr.msk.f32.vlgmr.msra.gmra.mxu1 %vm1080_vm1, %v1579_v60 }
 0xeac   :  { %2238 = vmatpush3.msra.mxu1 %v3109_v17  ;;  %2245 = vmatprep.mubr.msk.f32.mxu1 %vm2346_vm0, %v2345_v28  ;;  %v2297_v17 = vld [vmem:[%s3282_s8] ss:$0 sm:$0xff] }
 0xead   :  { %2239 = vmatprep.subr.mxu1 %v2345_v28  ;;  %v1065_v9 = vadd.f32 %v2297_v17, %v3142_v54  ;;  %v1070_v50 = vadd.f32 %v2297_v17, %v3140_v58 }
 0xeae   :  { %2240 = vmatpush3.msra.mxu1 %v3118_v2  ;;  %v1060_v2 = vadd.f32 %v2297_v17, %v3136_v3 }
 0xeaf   :  { %2241 = vmatprep.subr.mxu1 %v2345_v28 }
 0xeb0   :  { %2242 = vmatpush3.msra.mxu1 %v3125_v31 }
 0xeb1   :  { %2243 = vmatprep.subr.mxu1 %v2345_v28 }
 0xeb2   :  { %2244 = vmatpush3.msra.mxu1 %v3132_v16 }
 0xf6b   :  { %v1648_v32 = vpop.f32.mrf.mxu1 }
 0xf6c   :  { %v1649_v33 = vadd.f32 %v3168_v42, %v1648_v32 }
 0xf6d   :  { %v2225_v18 = vpop.f32.mrf.mxu1 }
 0xf6e   :  { %1658 = vrot.lane.b32.xlu0 %v1649_v33, %s2347_s23  ;;  %v1652_v63 = vadd.f32 %v1649_v33, %v1060_v2 }
 0xf70   :  { %v1653_v22 = vmul.f32 0.5, %v1652_v63 }
 0xf72   :  { %2280 = vtanh.f32 %v1653_v22 }
 0xf7f   :  { %v2281_v31 = vpop.eup %2280 }
 0xf80   :  { %v1655_v59 = vmul.f32 0.5, %v2281_v31 }
 0xf82   :  { %v1656_v28 = vadd.f32 0.5, %v1655_v59 }
 0xf84   :  { %v1668_v39 = vsub.f32 1.0, %v1656_v28  ;;  %v1674_v3 = vmul.f32 %v1656_v28, %v3197_v19 }
 0xfe0   :  { %v1659_v14 = vpop.permute.xlu0 %1658 }
 0xfe1   :  { %v1661_v16 = vmul.f32 %v1659_v14, %v1656_v28 }
 0xfe3   :  { %1663 = vrot.lane.b32.xlu1 %v1661_v16, %s2347_s23 }
0x1055   :  { %v1664_v37 = vpop.permute.xlu1 %1663 }
0x1056   :  { %v1666_v49 = vadd.f32 %v1664_v37, %v1060_v2 }
0x1058   :  { %2282 = vtanh.f32 %v1666_v49 }
0x1065   :  { %v2283_v41 = vpop.eup %2282 }
0x1066   :  { %1670 = vrot.lane.b32.xlu0 %v2283_v41, %s2349_s27 }
0x10d8   :  { %v1671_v13 = vpop.permute.xlu0 %1670 }
0x10d9   :  { %v1673_v51 = vmul.f32 %v1671_v13, %v1668_v39 }
0x10db   :  { %v3220_v45 = vadd.f32 %v1674_v3, %v1673_v51 }
0x10dd   :  { %1677 = vrot.lane.b32.xlu1 %v3220_v45, %s2349_s27 }
0x114f   :  { %v1678_v20 = vpop.permute.xlu1 %1677 }
0x1150   :  { %2235 = vmatmul.mubr.msk.f32.vlgmr.msra.gmra.mxu0 %vm1080_vm1, %v1678_v20 }
0x1210   :  { %v1747_v21 = vpop.f32.mrf.mxu0 }
0x1211   :  { %v1748_v23 = vadd.f32 %v3168_v42, %v1747_v21 }
0x1212   :  { %v2236_v8 = vpop.f32.mrf.mxu0 }
0x1213   :  { %1757 = vrot.lane.b32.xlu0 %v1748_v23, %s2347_s23  ;;  %v1751_v10 = vadd.f32 %v1748_v23, %v1065_v9  ;;  %v2093_v23 = vld [vmem:[#allocation2] ss:$0 sm:$0xff] }
0x1215   :  { %v1752_v47 = vmul.f32 0.5, %v1751_v10 }
0x1217   :  { %2284 = vtanh.f32 %v1752_v47 }
0x1224   :  { %v2285_v62 = vpop.eup %2284 }
0x1225   :  { %v1754_v26 = vmul.f32 0.5, %v2285_v62 }
0x1227   :  { %v1755_v35 = vadd.f32 0.5, %v1754_v26 }
0x1229   :  { %v1767_v30 = vsub.f32 1.0, %v1755_v35  ;;  %v1773_v54 = vmul.f32 %v1755_v35, %v3220_v45 }
0x1285   :  { %v1758_v24 = vpop.permute.xlu0 %1757 }
0x1286   :  { %v1760_v6 = vmul.f32 %v1758_v24, %v1755_v35  ;;  %v1987_v24 = vand.u32 127, %v268_v43 }
0x1288   :  { %1762 = vrot.lane.b32.xlu1 %v1760_v6, %s2347_s23 }
0x12fa   :  { %v1763_v0 = vpop.permute.xlu1 %1762 }
0x12fb   :  { %v1765_v56 = vadd.f32 %v1763_v0, %v1065_v9 }
0x12fd   :  { %2286 = vtanh.f32 %v1765_v56 }
0x130a   :  { %v2287_v7 = vpop.eup %2286 }
0x130b   :  { %1769 = vrot.lane.b32.xlu0 %v2287_v7, %s2349_s27 }
0x137d   :  { %v1770_v57 = vpop.permute.xlu0 %1769 }
0x137e   :  { %v1772_v5 = vmul.f32 %v1770_v57, %v1767_v30  ;;  %v1990_v30 = vsub.s32 %v1987_v24, %v2561_v48 }
0x1380   :  { %v1774_v15 = vadd.f32 %v1773_v54, %v1772_v5 }
0x1382   :  { %1776 = vrot.lane.b32.xlu1 %v1774_v15, %s2349_s27 }
0x13f4   :  { %v1777_v52 = vpop.permute.xlu1 %1776 }
0x13f5   :  { %2246 = vmatmul.mubr.msk.f32.vlgmr.msra.gmra.mxu1 %vm1080_vm1, %v1777_v52 }
0x14b5   :  { %v1846_v38 = vpop.f32.mrf.mxu1 }
0x14b6   :  { %v1847_v53 = vadd.f32 %v3168_v42, %v1846_v38 }
0x14b7   :  { %v2247_v29 = vpop.f32.mrf.mxu1 }
0x14b8   :  { %1856 = vrot.lane.b32.xlu0 %v1847_v53, %s2347_s23  ;;  %v1850_v36 = vadd.f32 %v1847_v53, %v1070_v50 }
0x14ba   :  { %v1851_v34 = vmul.f32 0.5, %v1850_v36 }
0x14bc   :  { %1885 = vrot.lane.b32.xlu0 %v2092_v25, %s2348_s26  ;;  %2288 = vtanh.f32 %v1851_v34  ;;  %s2351_s26 = smov [#allocation3]  }
0x14c9   :  { %v2289_v40 = vpop.eup %2288 }
0x14ca   :  { %v1853_v46 = vmul.f32 0.5, %v2289_v40 }
0x14cc   :  { %v1854_v61 = vadd.f32 0.5, %v1853_v46 }
0x14ce   :  { %v1866_v59 = vsub.f32 1.0, %v1854_v61  ;;  %v1872_v14 = vmul.f32 %v1854_v61, %v1774_v15 }
0x152a   :  { %v1857_v27 = vpop.permute.xlu0 %1856 }
0x152b   :  { %v1859_v12 = vmul.f32 %v1857_v27, %v1854_v61 }
0x152d   :  { %1861 = vrot.lane.b32.xlu1 %v1859_v12, %s2347_s23  ;;  %s2053_s23 = sshll.u32 %s2350_s10, 4  ;;  %s2054_s23 = int_to_ptr.vmem [resolvable:$true] %s2053_s23 }
0x152e   :  { %v1886_v42 = vpop.permute.xlu0 %1885  ;;  %s2298_s29 = scalar_lea.vmem %s2054_s23, 128  ;;  %p2303_p1 = scmp.lt.s32.totalorder %s2054_s23, %s2054_s23 }
0x152f   :  { %v1888_v4 = vmul.f32 %v1886_v42, %v2685_v44  ;;  %v1890_v60 = vmul.f32 %v1886_v42, %v3150_v1  ;;  %v1892_v58 = vmul.f32 %v1886_v42, %v3197_v19  ;;  %v1894_v32 = vmul.f32 %v1886_v42, %v1774_v15  ;;  %p2299_p0 = scmp.ne.s32.totalorder %s2054_s23, %s2298_s29  ;;  %p2304_p2 = scmp.lt.s32.totalorder %s2298_s29, %s2298_s29 }
0x1530   :  { %v1889_v19 = vmul.f32 %v1886_v42, %v3079_v55  ;;  %v1891_v22 = vmul.f32 %v1886_v42, %v3176_v11  ;;  %v1893_v31 = vmul.f32 %v1886_v42, %v3220_v45 }
0x1531   :  { %1904 = vrot.lane.b32.xlu0 %v1888_v4, %s2349_s27  ;;  %p2305_p3 = por %p2304_p2, %p2303_p1 }
0x1533   :  { %p2306_p4 = pnand %p2305_p3, %p2299_p0 }
0x1535   :  { %1908 = vrot.lane.b32.xlu0 %v1890_v60, %s2349_s27 }
0x1539   :  { %1912 = vrot.lane.b32.xlu0 %v1892_v58, %s2349_s27 }
0x153d   :  { %1916 = vrot.lane.b32.xlu0 %v1894_v32, %s2349_s27 }
0x159f   :  { %v1862_v33 = vpop.permute.xlu1 %1861 }
0x15a0   :  { %v1864_v18 = vadd.f32 %v1862_v33, %v1070_v50 }
0x15a2   :  { %2290 = vtanh.f32 %v1864_v18 }
0x15a3   :  { %v1905_v17 = vpop.permute.xlu0 %1904 }
0x15a4   :  { %v1928_v2 = vsel %vm1080_vm1, %v1905_v17, 0.0 }
0x15a5   :  { %1929 = vadd.xlane.f32.xlu0 %v1928_v2 }
0x15a7   :  { %v1909_v44 = vpop.permute.xlu0 %1908 }
0x15a8   :  { %v1934_v63 = vsel %vm1080_vm1, %v1909_v44, 0.0 }
0x15a9   :  { %1935 = vadd.xlane.f32.xlu0 %v1934_v63 }
0x15ab   :  { %v1913_v3 = vpop.permute.xlu0 %1912 }
0x15ac   :  { %v1940_v45 = vsel %vm1080_vm1, %v1913_v3, 0.0 }
0x15af   :  { %v2291_v1 = vpop.eup %2290  ;;  %v1917_v20 = vpop.permute.xlu0 %1916 }
0x15b0   :  { %1868 = vrot.lane.b32.xlu1 %v2291_v1, %s2349_s27  ;;  %v1946_v21 = vsel %vm1080_vm1, %v1917_v20, 0.0 }
0x15b4   :  { %1906 = vrot.lane.b32.xlu1 %v1889_v19, %s2349_s27 }
0x15b8   :  { %1910 = vrot.lane.b32.xlu1 %v1891_v22, %s2349_s27 }
0x15bc   :  { %1914 = vrot.lane.b32.xlu1 %v1893_v31, %s2349_s27 }
0x1622   :  { %v1869_v28 = vpop.permute.xlu1 %1868 }
0x1623   :  { %v1871_v16 = vmul.f32 %v1869_v28, %v1866_v59 }
0x1625   :  { %v1873_v37 = vadd.f32 %v1872_v14, %v1871_v16 }
0x1626   :  { %v1907_v49 = vpop.permute.xlu1 %1906 }
0x1627   :  { %v1895_v41 = vmul.f32 %v1886_v42, %v1873_v37  ;;  %v1931_v51 = vsel %vm1080_vm1, %v1907_v49, 0.0 }
0x1629   :  { %1918 = vrot.lane.b32.xlu1 %v1895_v41, %s2349_s27 }
0x162a   :  { %v1911_v55 = vpop.permute.xlu1 %1910 }
0x162b   :  { %v1937_v39 = vsel %vm1080_vm1, %v1911_v55, 0.0 }
0x162c   :  { %1938 = vadd.xlane.f32.xlu0 %v1937_v39 }
0x162e   :  { %v1915_v11 = vpop.permute.xlu1 %1914  ;;  %v1930_v26 = vpop.xlane.xlu0 %1929 }
0x162f   :  { %v1943_v13 = vsel %vm1080_vm1, %v1915_v11, 0.0 }
0x1630   :  { %1944 = vadd.xlane.f32.xlu0 %v1943_v13 }
0x1632   :  { %v1936_v56 = vpop.xlane.xlu0 %1935 }
0x164d   :  { %1932 = vadd.xlane.f32.xlu1 %v1931_v51 }
0x1651   :  { %1941 = vadd.xlane.f32.xlu1 %v1940_v45 }
0x1655   :  { %1947 = vadd.xlane.f32.xlu1 %v1946_v21 }
0x1666   :  { %1959 = vperm.xlu1 %2259, %v2093_v23  }
0x169b   :  { %v1919_v8 = vpop.permute.xlu1 %1918 }
0x169c   :  { %v1949_v9 = vsel %vm1080_vm1, %v1919_v8, 0.0 }
0x169d   :  { %1950 = vadd.xlane.f32.xlu0 %v1949_v9 }
0x16b3   :  { %1875 = vrot.lane.b32.xlu0 %v1873_v37, %s2349_s27  ;;  %s2043_s27 = sshll.u32 %s2351_s26, 4  ;;  %s2044_s27 = int_to_ptr.vmem [resolvable:$true] %s2043_s27 }
0x16b5   :  { %v1939_v5 = vpop.xlane.xlu0 %1938 }
0x16b9   :  { %v1945_v43 = vpop.xlane.xlu0 %1944 }
0x16d6   :  { %v1933_v10 = vpop.xlane.xlu1 %1932 }
0x16da   :  { %v1942_v47 = vpop.xlane.xlu1 %1941 }
0x16de   :  { %v1948_v62 = vpop.xlane.xlu1 %1947 }
0x16e2   :  { %v1960_v35 = vpop.permute.xlu1 %1959 }
0x16e3   :  { %v1962_v6 = vadd.f32 %v1960_v35, %v1930_v26  ;;  %v1963_v0 = vadd.f32 %v1960_v35, %v1933_v10  ;;  %v1964_v7 = vadd.f32 %v1960_v35, %v1936_v56  ;;  %v1965_v52 = vadd.f32 %v1960_v35, %v1939_v5 }
0x16e4   :  { %v1966_v29 = vadd.f32 %v1960_v35, %v1942_v47  ;;  %v1967_v34 = vadd.f32 %v1960_v35, %v1945_v43  ;;  %v1968_v48 = vadd.f32 %v1960_v35, %v1948_v62 }
0x16e5   :  { %v1970_v57 = vmax.f32 %v1962_v6, 0.0  ;;  %v1971_v54 = vmax.f32 %v1963_v0, 0.0  ;;  %v1972_v15 = vmax.f32 %v1964_v7, 0.0  ;;  %v1973_v50 = vmax.f32 %v1965_v52, 0.0 }
0x16e6   :  { %v1974_v40 = vmax.f32 %v1966_v29, 0.0  ;;  %v1975_v27 = vmax.f32 %v1967_v34, 0.0  ;;  %v1976_v60 = vmax.f32 %v1968_v48, 0.0 }
0x16e7   :  { %v1991_v38 = vrot.slane %v1970_v57, %v1990_v30  ;;  %v1995_v53 = vrot.slane %v1971_v54, %v1990_v30  ;;  %v1999_v25 = vrot.slane %v1972_v15, %v1990_v30  ;;  %v2003_v61 = vrot.slane %v1973_v50, %v1990_v30 }
0x16e8   :  { %v2007_v42 = vrot.slane %v1974_v40, %v1990_v30  ;;  %v2011_v33 = vrot.slane %v1975_v27, %v1990_v30  ;;  %v2015_v44 = vrot.slane %v1976_v60, %v1990_v30 }
0x16e9   :  { %v2021_v36 = vsel %vm2020_vm4, %v1995_v53, %v1991_v38 }
0x16ea   :  { %v2023_v46 = vsel %vm2022_vm5, %v1999_v25, %v2021_v36 }
0x16eb   :  { %v2025_v12 = vsel %vm2024_vm6, %v2003_v61, %v2023_v46 }
0x16ec   :  { %v2027_v58 = vsel %vm2026_vm7, %v2007_v42, %v2025_v12 }
0x16ed   :  { %v2029_v17 = vsel %vm2028_vm8, %v2011_v33, %v2027_v58 }
0x16ee   :  { %v2031_v1 = vsel %vm2030_vm9, %v2015_v44, %v2029_v17 }
0x1726   :  { %v1951_v4 = vpop.xlane.xlu0 %1950 }
0x1727   :  { %v1969_v32 = vadd.f32 %v1960_v35, %v1951_v4 }
0x1729   :  { %v1977_v18 = vmax.f32 %v1969_v32, 0.0 }
0x172a   :  { %v1876_v2 = vpop.permute.xlu0 %1875 }
0x172b   :  { %v2019_v63 = vrot.slane %v1977_v18, %v1990_v30  ;;  %1878 = vst.msk [vmem:[#allocation5] sm:$0xff] %vm1080_vm1, %v1876_v2 }
0x172c   :  { %2309 = shalt.err (!%p2306_p4)
}
0x172d   :  { %2056 = dma.vmem_to_hbm [thread:$0]  %s2054_s23, 128, %s3287_s13, [#allocation6]   ;;  %v2033_v19 = vsel %vm2032_vm10, %v2019_v63, %v2031_v1 }
0x172e   :  { %2036 = vst.msk [vmem:[#allocation3] sm:$0xff] %vm2035_vm11, %v2033_v19  ;;  %s2318_s15 = scalar_lea.vmem %s2044_s27, 128  ;;  %p2323_p6 = scmp.lt.s32.totalorder %s2044_s27, %s2044_s27 }
0x172f   :  { %p2319_p5 = scmp.ne.s32.totalorder %s2044_s27, %s2318_s15  ;;  %p2324_p7 = scmp.lt.s32.totalorder %s2318_s15, %s2318_s15 }
0x1731   :  { %p2325_p8 = por %p2324_p7, %p2323_p6 }
0x1733   :  { %p2326_p9 = pnand %p2325_p8, %p2319_p5 }
0x1735   :  { %2329 = shalt.err (!%p2326_p9)
}
0x1736   :  { %2046 = dma.vmem_to_hbm [thread:$0]  %s2044_s27, 128, %s3286_s12, [#allocation4]  }
0x1737   :  { %2338 = dma.done.wait [#allocation4], 128  }
0x1738   :  { %2339 = vsyncadd [#allocation4], 4294967168 }
0x1739   :  { %2340 = dma.done.wait [#allocation6], 128  }
0x173a   :  { %2341 = vsyncadd [#allocation6], 4294967168 }
0x173b   :  { %2063 = vsyncpa [#allocation4], 1 }
0x173c   :  { %2064 = vsyncpa [#allocation6], 1 }

</bundles_post_ra>
